<compile_context>
chip_gen: v5e
topology: v5e:2x2
jax: 0.10.0
libtpu: 0.0.40
codegen_flags: <defaults>
</compile_context>

<pallas_src>
import jax
import jax.numpy as jnp
import numpy as np
from jax.experimental import pallas as pl
from jax.experimental.pallas import tpu as pltpu


def decoder_crf_kernel(x_ref, h0_ref, data_ref, wslab_ref, scal_ref,
                       out_ref, h_scratch):
    twoT, B = data_ref.shape
    T = twoT // 2
    H = h0_ref.shape[-1]

    # ---- unpack the lane-dense weight slab (single DMA) ----
    w_hh = wslab_ref[0:H, :]                       # (H, 4H)
    w_ih = wslab_ref[H:H + 1, :]                   # (1, 4H)
    bias = wslab_ref[H + 1:H + 2, :]               # (1, 4H)  (b_ih + b_hh)
    wdiff = wslab_ref[H + 2:H + 3, 0:H]            # (1, H)   tag-logit difference

    # ---- hoisted input projection: independent of the recurrence state ----
    x_bt = x_ref[...]                              # (B, T), lane-dense
    inp = [x_bt[:, t:t + 1] * w_ih + bias for t in range(T)]   # each (B, 4H)
    # TODO(synk): for much larger T, compute inp[t] in-loop (or lax.fori_loop)
    #             to bound vreg live ranges instead of keeping T vregs live.

    h = h0_ref[...]                                # (B, H)
    c = jnp.zeros((B, H), jnp.float32)             # torch.zeros(hidden.size())

    # ---- LSTM recurrence (the only truly serial MXU work) ----
    # TODO(synk): w_hh could be held resident in the MXU across steps via
    # pltpu.matmul_push_rhs / matmul_acc_lhs / matmul_pop; kept as jnp.dot for
    # portable lowering across v5e/v6e/v7x.
    for t in range(T):
        gates = jnp.dot(h, w_hh, preferred_element_type=jnp.float32) + inp[t]
        # full-vreg activations: 3 EUP pushes per step instead of 5
        sig = jax.nn.sigmoid(gates)                # (B, 4H)
        tnh = jnp.tanh(gates)                      # (B, 4H)
        i_g = sig[:, 0 * H:1 * H]
        f_g = sig[:, 1 * H:2 * H]
        g_g = tnh[:, 2 * H:3 * H]
        o_g = sig[:, 3 * H:4 * H]
        c = f_g * c + i_g * g_g
        h = o_g * jnp.tanh(c)
        h_scratch[t] = h                           # stash hidden state

    # ---- emission probabilities, vectorized over all (T, B) positions ----
    # 2-class softmax == sigmoid of the logit difference.
    b_diff = scal_ref[8]
    d = jnp.sum(h_scratch[...] * wdiff.reshape(1, 1, H), axis=-1) + b_diff  # (T,B)
    em1 = jax.nn.sigmoid(d)                        # P(tag = 1)
    em0 = 1.0 - em1                                # P(tag = 0) == sigmoid(-d)

    tags = data_ref[0:T, :]                        # (T, B) float {0., 1.}
    mask = data_ref[T:2 * T, :]                    # (T, B) float {0., 1.}

    s0 = scal_ref[0]
    s1 = scal_ref[1]
    e0 = scal_ref[2]
    e1 = scal_ref[3]
    t00 = scal_ref[4]
    t01 = scal_ref[5]
    t10 = scal_ref[6]
    t11 = scal_ref[7]

    # ---- CRF numerator: fully vectorized over time ----
    em_sc = em0 * (1.0 - tags) + em1 * tags                               # (T, B)
    prev = tags[:-1, :]
    cur = tags[1:, :]                                                     # (T-1, B)
    tr_sc = (t00 * (1.0 - prev) * (1.0 - cur) + t01 * (1.0 - prev) * cur
             + t10 * prev * (1.0 - cur) + t11 * prev * cur)               # (T-1, B)
    start_sc = s0 * (1.0 - tags[0:1, :]) + s1 * tags[0:1, :]              # (1, B)
    steps = jnp.sum((tr_sc + em_sc[1:, :]) * mask[1:, :],
                    axis=0, keepdims=True)                                # (1, B)
    # last tag from mask differences (mask is a monotone prefix mask, mask[0]==1)
    last_tag = (jnp.sum(tags[:-1, :] * (mask[:-1, :] - mask[1:, :]),
                        axis=0, keepdims=True)
                + tags[T - 1:T, :] * mask[T - 1:T, :])                    # (1, B)
    end_sc = e0 * (1.0 - last_tag) + e1 * last_tag
    numerator = start_sc + em_sc[0:1, :] + steps + end_sc                 # (1, B)

    # ---- CRF denominator: forward algorithm, state packed into one (2,B) vreg ----
    def two_rows(v0, v1):                          # hoisted scalar broadcasts
        return jnp.concatenate([jnp.full((1, B), v0, jnp.float32),
                                jnp.full((1, B), v1, jnp.float32)], axis=0)

    from0 = two_rows(t00, t01)                     # scores leaving state 0
    from1 = two_rows(t10, t11)                     # scores leaving state 1
    start2 = two_rows(s0, s1)
    end2 = two_rows(e0, e1)

    def em_step(t):                                # (2, B): [em0[t]; em1[t]]
        return jnp.concatenate([em0[t:t + 1, :], em1[t:t + 1, :]], axis=0)

    def lae(a, b):                                 # elementwise logaddexp
        mx = jnp.maximum(a, b)
        mn = jnp.minimum(a, b)
        return mx + jnp.log1p(jnp.exp(mn - mx))    # one exp + one log1p

    alpha = start2 + em_step(0)                    # (2, B)
    for t in range(1, T):
        mt = mask[t:t + 1, :]
        nxt = lae(alpha[0:1, :] + from0, alpha[1:2, :] + from1) + em_step(t)
        alpha = jnp.where(mt > 0.0, nxt, alpha)
    af = alpha + end2
    denominator = lae(af[0:1, :], af[1:2, :])      # (1, B)

    out_ref[...] = -jnp.sum(numerator - denominator, axis=1, keepdims=True)


def init_params(key, hidden_dim):
    H = 2 * hidden_dim
    ks = jax.random.split(key, 9)
    scale = 0.1
    w_ih = jax.random.normal(ks[0], (4 * H, 1), jnp.float32) * scale   # LSTM weight_ih
    w_hh = jax.random.normal(ks[1], (4 * H, H), jnp.float32) * scale   # LSTM weight_hh
    b_ih = jax.random.normal(ks[2], (4 * H,), jnp.float32) * scale
    b_hh = jax.random.normal(ks[3], (4 * H,), jnp.float32) * scale
    w_tag = jax.random.normal(ks[4], (2, H), jnp.float32) * scale      # hidden2tag
    b_tag = jax.random.normal(ks[5], (2,), jnp.float32) * scale
    start = jax.random.normal(ks[6], (2,), jnp.float32) * scale        # CRF params
    end = jax.random.normal(ks[7], (2,), jnp.float32) * scale
    trans = jax.random.normal(ks[8], (2, 2), jnp.float32) * scale
    return {
        "w_ih_t": jnp.transpose(w_ih),             # (1, 4H)
        "w_hh_t": jnp.transpose(w_hh),             # (H, 4H)
        "b": (b_ih + b_hh).reshape(1, 4 * H),      # (1, 4H)
        "w_tag_t": jnp.transpose(w_tag),           # (H, 2)
        "b_tag": b_tag.reshape(1, 2),              # (1, 2)
        "start": start,                            # (2,)
        "end": end,                                # (2,)
        "trans_flat": trans.reshape(4),            # (4,) row-major [t00,t01,t10,t11]
    }


def pack_params(params):
    """Build the lane-dense weight slab and SMEM scalar vector once."""
    H = params["w_hh_t"].shape[0]
    w_diff = params["w_tag_t"][:, 1] - params["w_tag_t"][:, 0]          # (H,)
    b_diff = params["b_tag"][0, 1] - params["b_tag"][0, 0]
    wdiff_row = jnp.zeros((1, 4 * H), jnp.float32).at[0, :H].set(w_diff)
    w_slab = jnp.concatenate([params["w_hh_t"],                         # rows 0..H-1
                              params["w_ih_t"],                         # row H
                              params["b"],                              # row H+1
                              wdiff_row], axis=0).astype(jnp.float32)   # row H+2
    # scalar vector: [s0, s1, e0, e1, t00, t01, t10, t11, b_diff]
    scal = jnp.concatenate([params["start"], params["end"],
                            params["trans_flat"],
                            b_diff.reshape(1)]).astype(jnp.float32)
    return {"w_slab": w_slab, "scal": scal}


def decoder_crf_loss(input_features, hidden, tags, masks, packed):
    """input_features: (T,B,1) float; hidden: (1,B,H); tags: (B,T,1); masks: (T,B,1)."""
    T, B, _ = input_features.shape
    H = hidden.shape[-1]

    # glue mirroring the torch forward's permute / squeeze / dtype casts
    x_bt = jnp.transpose(input_features[:, :, 0]).astype(jnp.float32)          # (B, T)
    h0 = hidden.astype(jnp.float32)[0]                                         # (B, H)
    tags_tb = jnp.transpose(tags, (1, 0, 2))[:, :, 0].astype(jnp.float32)      # (T, B)
    mask_tb = masks[:, :, 0].astype(jnp.float32)                               # (T, B)
    data_slab = jnp.concatenate([tags_tb, mask_tb], axis=0)                    # (2T, B)

    vmem = pltpu.MemorySpace.VMEM
    smem = pltpu.MemorySpace.SMEM
    out = pl.pallas_call(
        decoder_crf_kernel,
        out_shape=jax.ShapeDtypeStruct((1, 1), jnp.float32),
        in_specs=[pl.BlockSpec(memory_space=vmem)] * 4
        + [pl.BlockSpec(memory_space=smem)],
        out_specs=pl.BlockSpec(memory_space=vmem),
        scratch_shapes=[pltpu.VMEM((T, B, H), jnp.float32)],
    )(x_bt, h0, data_slab, packed["w_slab"], packed["scal"])
    return out[0, 0]


def reference_loss(x, h0, tags_tb, mask_tb, params):
    """Pure-JAX reference (same math, torchcrf semantics)."""
    T, B, _ = x.shape
    H = h0.shape[-1]
    w_ih, w_hh, b = params["w_ih_t"], params["w_hh_t"], params["b"]
    h = h0[0]
    c = jnp.zeros((B, H), jnp.float32)
    ems = []
    for t in range(T):
        gates = x[t] * w_ih + h @ w_hh + b
        i_g = jax.nn.sigmoid(gates[:, :H])
        f_g = jax.nn.sigmoid(gates[:, H:2 * H])
        g_g = jnp.tanh(gates[:, 2 * H:3 * H])
        o_g = jax.nn.sigmoid(gates[:, 3 * H:])
        c = f_g * c + i_g * g_g
        h = o_g * jnp.tanh(c)
        ems.append(jax.nn.softmax(h @ params["w_tag_t"] + params["b_tag"], axis=-1))
    em = jnp.stack(ems)                                   # (T, B, 2)
    tags, mask = tags_tb, mask_tb
    start, end = params["start"], params["end"]
    trans = params["trans_flat"].reshape(2, 2)
    bidx = jnp.arange(B)
    score = start[tags[0]] + em[0, bidx, tags[0]]
    for t in range(1, T):
        score = score + (trans[tags[t - 1], tags[t]] + em[t, bidx, tags[t]]) * mask[t]
    seq_ends = mask.astype(jnp.int32).sum(0) - 1
    last_tags = tags[seq_ends, bidx]
    score = score + end[last_tags]
    alpha = start[None, :] + em[0]
    for t in range(1, T):
        nxt = jax.scipy.special.logsumexp(
            alpha[:, :, None] + trans[None] + em[t][:, None, :], axis=1)
        alpha = jnp.where(mask[t][:, None] > 0, nxt, alpha)
    alpha = alpha + end[None, :]
    denom = jax.scipy.special.logsumexp(alpha, axis=1)
    return -jnp.sum(score - denom)


if __name__ == "__main__":
    hidden_dim = 16
    H = 2 * hidden_dim          # LSTM hidden size = 32, 4H = 128 (one full lane tile)
    T, B = 8, 8

    key = jax.random.PRNGKey(0)
    k_par, k_x, k_h, k_tag, k_len = jax.random.split(key, 5)
    params = init_params(k_par, hidden_dim)
    packed = pack_params(params)

    input_features = jax.random.uniform(k_x, (T, B, 1), jnp.float32)   # floats in [0, 1]
    hidden = jax.random.normal(k_h, (1, B, H), jnp.float32)            # last hidden state
    tags_raw = jax.random.randint(k_tag, (B, T, 1), 0, 2)              # (batch, seq, 1)
    lengths = jax.random.randint(k_len, (B,), 1, T + 1)                # mask[0] == 1 everywhere
    masks_raw = (jnp.arange(T)[:, None] < lengths[None, :]).astype(jnp.uint8)[:, :, None]  # (T,B,1)

    loss = decoder_crf_loss(input_features, hidden, tags_raw, masks_raw, packed)
    loss = jax.block_until_ready(loss)

    # silent correctness check against a pure-JAX reference
    tags_tb = jnp.transpose(tags_raw, (1, 0, 2)).squeeze(-1).astype(jnp.int32)
    mask_tb = masks_raw.squeeze(-1).astype(jnp.float32)
    ref = reference_loss(input_features, hidden, tags_tb, mask_tb, params)
    np.testing.assert_allclose(np.asarray(loss), np.asarray(ref), rtol=1e-3, atol=1e-3)

    print("KERNEL_OK")
</pallas_src>

<mosaic_0001>
module attributes {stable_mosaic.version = 11 : i64} {
  func.func @decoder_crf_kernel(%arg0: memref<8x8xf32, #tpu.memory_space<vmem>>, %arg1: memref<8x32xf32, #tpu.memory_space<vmem>>, %arg2: memref<16x8xf32, #tpu.memory_space<vmem>>, %arg3: memref<35x128xf32, #tpu.memory_space<vmem>>, %arg4: memref<9xf32, #tpu.memory_space<smem>>, %arg5: memref<1x1xf32, #tpu.memory_space<vmem>>, %arg6: memref<8x8x32xf32, #tpu.memory_space<vmem>>) attributes {dimension_semantics = [], scalar_prefetch = 0 : i64, scratch_operands = 1 : i64, tpu.core_type = #tpu.core_type<tc>} {
    %c0 = arith.constant 0 : index
    %c0_0 = arith.constant 0 : index
    %0 = vector.load %arg3[%c0, %c0_0] : memref<35x128xf32, #tpu.memory_space<vmem>>, vector<32x128xf32>
    %c32 = arith.constant 32 : index
    %c0_1 = arith.constant 0 : index
    %1 = vector.load %arg3[%c32, %c0_1] : memref<35x128xf32, #tpu.memory_space<vmem>>, vector<1x128xf32>
    %c33 = arith.constant 33 : index
    %c0_2 = arith.constant 0 : index
    %2 = vector.load %arg3[%c33, %c0_2] : memref<35x128xf32, #tpu.memory_space<vmem>>, vector<1x128xf32>
    %c34 = arith.constant 34 : index
    %c0_3 = arith.constant 0 : index
    %3 = vector.load %arg3[%c34, %c0_3] : memref<35x128xf32, #tpu.memory_space<vmem>>, vector<1x32xf32>
    %c0_4 = arith.constant 0 : index
    %c0_5 = arith.constant 0 : index
    %4 = vector.load %arg0[%c0_4, %c0_5] : memref<8x8xf32, #tpu.memory_space<vmem>>, vector<8x8xf32>
    %5 = vector.extract_strided_slice %4 {offsets = [0, 0], sizes = [8, 1], strides = [1, 1]} : vector<8x8xf32> to vector<8x1xf32>
    %6 = vector.broadcast %5 : vector<8x1xf32> to vector<8x128xf32>
    %7 = vector.broadcast %1 : vector<1x128xf32> to vector<8x128xf32>
    %8 = arith.mulf %6, %7 : vector<8x128xf32>
    %9 = vector.broadcast %2 : vector<1x128xf32> to vector<8x128xf32>
    %10 = arith.addf %8, %9 : vector<8x128xf32>
    %11 = vector.extract_strided_slice %4 {offsets = [0, 1], sizes = [8, 1], strides = [1, 1]} : vector<8x8xf32> to vector<8x1xf32>
    %12 = vector.broadcast %11 : vector<8x1xf32> to vector<8x128xf32>
    %13 = vector.broadcast %1 : vector<1x128xf32> to vector<8x128xf32>
    %14 = arith.mulf %12, %13 : vector<8x128xf32>
    %15 = vector.broadcast %2 : vector<1x128xf32> to vector<8x128xf32>
    %16 = arith.addf %14, %15 : vector<8x128xf32>
    %17 = vector.extract_strided_slice %4 {offsets = [0, 2], sizes = [8, 1], strides = [1, 1]} : vector<8x8xf32> to vector<8x1xf32>
    %18 = vector.broadcast %17 : vector<8x1xf32> to vector<8x128xf32>
    %19 = vector.broadcast %1 : vector<1x128xf32> to vector<8x128xf32>
    %20 = arith.mulf %18, %19 : vector<8x128xf32>
    %21 = vector.broadcast %2 : vector<1x128xf32> to vector<8x128xf32>
    %22 = arith.addf %20, %21 : vector<8x128xf32>
    %23 = vector.extract_strided_slice %4 {offsets = [0, 3], sizes = [8, 1], strides = [1, 1]} : vector<8x8xf32> to vector<8x1xf32>
    %24 = vector.broadcast %23 : vector<8x1xf32> to vector<8x128xf32>
    %25 = vector.broadcast %1 : vector<1x128xf32> to vector<8x128xf32>
    %26 = arith.mulf %24, %25 : vector<8x128xf32>
    %27 = vector.broadcast %2 : vector<1x128xf32> to vector<8x128xf32>
    %28 = arith.addf %26, %27 : vector<8x128xf32>
    %29 = vector.extract_strided_slice %4 {offsets = [0, 4], sizes = [8, 1], strides = [1, 1]} : vector<8x8xf32> to vector<8x1xf32>
    %30 = vector.broadcast %29 : vector<8x1xf32> to vector<8x128xf32>
    %31 = vector.broadcast %1 : vector<1x128xf32> to vector<8x128xf32>
    %32 = arith.mulf %30, %31 : vector<8x128xf32>
    %33 = vector.broadcast %2 : vector<1x128xf32> to vector<8x128xf32>
    %34 = arith.addf %32, %33 : vector<8x128xf32>
    %35 = vector.extract_strided_slice %4 {offsets = [0, 5], sizes = [8, 1], strides = [1, 1]} : vector<8x8xf32> to vector<8x1xf32>
    %36 = vector.broadcast %35 : vector<8x1xf32> to vector<8x128xf32>
    %37 = vector.broadcast %1 : vector<1x128xf32> to vector<8x128xf32>
    %38 = arith.mulf %36, %37 : vector<8x128xf32>
    %39 = vector.broadcast %2 : vector<1x128xf32> to vector<8x128xf32>
    %40 = arith.addf %38, %39 : vector<8x128xf32>
    %41 = vector.extract_strided_slice %4 {offsets = [0, 6], sizes = [8, 1], strides = [1, 1]} : vector<8x8xf32> to vector<8x1xf32>
    %42 = vector.broadcast %41 : vector<8x1xf32> to vector<8x128xf32>
    %43 = vector.broadcast %1 : vector<1x128xf32> to vector<8x128xf32>
    %44 = arith.mulf %42, %43 : vector<8x128xf32>
    %45 = vector.broadcast %2 : vector<1x128xf32> to vector<8x128xf32>
    %46 = arith.addf %44, %45 : vector<8x128xf32>
    %47 = vector.extract_strided_slice %4 {offsets = [0, 7], sizes = [8, 1], strides = [1, 1]} : vector<8x8xf32> to vector<8x1xf32>
    %48 = vector.broadcast %47 : vector<8x1xf32> to vector<8x128xf32>
    %49 = vector.broadcast %1 : vector<1x128xf32> to vector<8x128xf32>
    %50 = arith.mulf %48, %49 : vector<8x128xf32>
    %51 = vector.broadcast %2 : vector<1x128xf32> to vector<8x128xf32>
    %52 = arith.addf %50, %51 : vector<8x128xf32>
    %c0_6 = arith.constant 0 : index
    %c0_7 = arith.constant 0 : index
    %53 = vector.load %arg1[%c0_6, %c0_7] : memref<8x32xf32, #tpu.memory_space<vmem>>, vector<8x32xf32>
    %cst = arith.constant 0.000000e+00 : f32
    %54 = vector.broadcast %cst : f32 to vector<8x32xf32>
    %cst_8 = arith.constant dense<0.000000e+00> : vector<8x128xf32>
    %55 = tpu.matmul %53, %0, %cst_8 {dimension_numbers = #tpu.dot_dimension_numbers<[1], [0], [0], [1], [0, 0, 1, 1], [], []>} : vector<8x32xf32>, vector<32x128xf32>, vector<8x128xf32> -> vector<8x128xf32>
    %56 = arith.addf %55, %10 : vector<8x128xf32>
    %57 = arith.negf %56 : vector<8x128xf32>
    %58 = math.exp %57 : vector<8x128xf32>
    %cst_9 = arith.constant 1.000000e+00 : f32
    %59 = vector.broadcast %cst_9 : f32 to vector<8x128xf32>
    %60 = arith.addf %59, %58 : vector<8x128xf32>
    %61 = arith.divf %59, %60 : vector<8x128xf32>
    %62 = math.tanh %56 : vector<8x128xf32>
    %63 = vector.extract_strided_slice %61 {offsets = [0, 0], sizes = [8, 32], strides = [1, 1]} : vector<8x128xf32> to vector<8x32xf32>
    %64 = vector.extract_strided_slice %61 {offsets = [0, 32], sizes = [8, 32], strides = [1, 1]} : vector<8x128xf32> to vector<8x32xf32>
    %65 = vector.extract_strided_slice %62 {offsets = [0, 64], sizes = [8, 32], strides = [1, 1]} : vector<8x128xf32> to vector<8x32xf32>
    %66 = vector.extract_strided_slice %61 {offsets = [0, 96], sizes = [8, 32], strides = [1, 1]} : vector<8x128xf32> to vector<8x32xf32>
    %67 = arith.mulf %64, %54 : vector<8x32xf32>
    %68 = arith.mulf %63, %65 : vector<8x32xf32>
    %69 = arith.addf %67, %68 : vector<8x32xf32>
    %70 = math.tanh %69 : vector<8x32xf32>
    %71 = arith.mulf %66, %70 : vector<8x32xf32>
    %c0_10 = arith.constant 0 : index
    %c0_11 = arith.constant 0 : index
    %c0_12 = arith.constant 0 : index
    %72 = vector.load %arg6[%c0_10, %c0_11, %c0_12] : memref<8x8x32xf32, #tpu.memory_space<vmem>>, vector<1x8x32xf32>
    %73 = vector.shape_cast %72 : vector<1x8x32xf32> to vector<8x32xf32>
    %74 = vector.shape_cast %71 : vector<8x32xf32> to vector<1x8x32xf32>
    tpu.vector_store %arg6[%c0_10, %c0_11, %c0_12], %74 {strides = array<i32>} : memref<8x8x32xf32, #tpu.memory_space<vmem>>, vector<1x8x32xf32>,
    %cst_13 = arith.constant dense<0.000000e+00> : vector<8x128xf32>
    %75 = tpu.matmul %71, %0, %cst_13 {dimension_numbers = #tpu.dot_dimension_numbers<[1], [0], [0], [1], [0, 0, 1, 1], [], []>} : vector<8x32xf32>, vector<32x128xf32>, vector<8x128xf32> -> vector<8x128xf32>
    %76 = arith.addf %75, %16 : vector<8x128xf32>
    %77 = arith.negf %76 : vector<8x128xf32>
    %78 = math.exp %77 : vector<8x128xf32>
    %cst_14 = arith.constant 1.000000e+00 : f32
    %79 = vector.broadcast %cst_14 : f32 to vector<8x128xf32>
    %80 = arith.addf %79, %78 : vector<8x128xf32>
    %81 = arith.divf %79, %80 : vector<8x128xf32>
    %82 = math.tanh %76 : vector<8x128xf32>
    %83 = vector.extract_strided_slice %81 {offsets = [0, 0], sizes = [8, 32], strides = [1, 1]} : vector<8x128xf32> to vector<8x32xf32>
    %84 = vector.extract_strided_slice %81 {offsets = [0, 32], sizes = [8, 32], strides = [1, 1]} : vector<8x128xf32> to vector<8x32xf32>
    %85 = vector.extract_strided_slice %82 {offsets = [0, 64], sizes = [8, 32], strides = [1, 1]} : vector<8x128xf32> to vector<8x32xf32>
    %86 = vector.extract_strided_slice %81 {offsets = [0, 96], sizes = [8, 32], strides = [1, 1]} : vector<8x128xf32> to vector<8x32xf32>
    %87 = arith.mulf %84, %69 : vector<8x32xf32>
    %88 = arith.mulf %83, %85 : vector<8x32xf32>
    %89 = arith.addf %87, %88 : vector<8x32xf32>
    %90 = math.tanh %89 : vector<8x32xf32>
    %91 = arith.mulf %86, %90 : vector<8x32xf32>
    %c1 = arith.constant 1 : index
    %c0_15 = arith.constant 0 : index
    %c0_16 = arith.constant 0 : index
    %92 = vector.load %arg6[%c1, %c0_15, %c0_16] : memref<8x8x32xf32, #tpu.memory_space<vmem>>, vector<1x8x32xf32>
    %93 = vector.shape_cast %92 : vector<1x8x32xf32> to vector<8x32xf32>
    %94 = vector.shape_cast %91 : vector<8x32xf32> to vector<1x8x32xf32>
    tpu.vector_store %arg6[%c1, %c0_15, %c0_16], %94 {strides = array<i32>} : memref<8x8x32xf32, #tpu.memory_space<vmem>>, vector<1x8x32xf32>,
    %cst_17 = arith.constant dense<0.000000e+00> : vector<8x128xf32>
    %95 = tpu.matmul %91, %0, %cst_17 {dimension_numbers = #tpu.dot_dimension_numbers<[1], [0], [0], [1], [0, 0, 1, 1], [], []>} : vector<8x32xf32>, vector<32x128xf32>, vector<8x128xf32> -> vector<8x128xf32>
    %96 = arith.addf %95, %22 : vector<8x128xf32>
    %97 = arith.negf %96 : vector<8x128xf32>
    %98 = math.exp %97 : vector<8x128xf32>
    %cst_18 = arith.constant 1.000000e+00 : f32
    %99 = vector.broadcast %cst_18 : f32 to vector<8x128xf32>
    %100 = arith.addf %99, %98 : vector<8x128xf32>
    %101 = arith.divf %99, %100 : vector<8x128xf32>
    %102 = math.tanh %96 : vector<8x128xf32>
    %103 = vector.extract_strided_slice %101 {offsets = [0, 0], sizes = [8, 32], strides = [1, 1]} : vector<8x128xf32> to vector<8x32xf32>
    %104 = vector.extract_strided_slice %101 {offsets = [0, 32], sizes = [8, 32], strides = [1, 1]} : vector<8x128xf32> to vector<8x32xf32>
    %105 = vector.extract_strided_slice %102 {offsets = [0, 64], sizes = [8, 32], strides = [1, 1]} : vector<8x128xf32> to vector<8x32xf32>
    %106 = vector.extract_strided_slice %101 {offsets = [0, 96], sizes = [8, 32], strides = [1, 1]} : vector<8x128xf32> to vector<8x32xf32>
    %107 = arith.mulf %104, %89 : vector<8x32xf32>
    %108 = arith.mulf %103, %105 : vector<8x32xf32>
    %109 = arith.addf %107, %108 : vector<8x32xf32>
    %110 = math.tanh %109 : vector<8x32xf32>
    %111 = arith.mulf %106, %110 : vector<8x32xf32>
    %c2 = arith.constant 2 : index
    %c0_19 = arith.constant 0 : index
    %c0_20 = arith.constant 0 : index
    %112 = vector.load %arg6[%c2, %c0_19, %c0_20] : memref<8x8x32xf32, #tpu.memory_space<vmem>>, vector<1x8x32xf32>
    %113 = vector.shape_cast %112 : vector<1x8x32xf32> to vector<8x32xf32>
    %114 = vector.shape_cast %111 : vector<8x32xf32> to vector<1x8x32xf32>
    tpu.vector_store %arg6[%c2, %c0_19, %c0_20], %114 {strides = array<i32>} : memref<8x8x32xf32, #tpu.memory_space<vmem>>, vector<1x8x32xf32>,
    %cst_21 = arith.constant dense<0.000000e+00> : vector<8x128xf32>
    %115 = tpu.matmul %111, %0, %cst_21 {dimension_numbers = #tpu.dot_dimension_numbers<[1], [0], [0], [1], [0, 0, 1, 1], [], []>} : vector<8x32xf32>, vector<32x128xf32>, vector<8x128xf32> -> vector<8x128xf32>
    %116 = arith.addf %115, %28 : vector<8x128xf32>
    %117 = arith.negf %116 : vector<8x128xf32>
    %118 = math.exp %117 : vector<8x128xf32>
    %cst_22 = arith.constant 1.000000e+00 : f32
    %119 = vector.broadcast %cst_22 : f32 to vector<8x128xf32>
    %120 = arith.addf %119, %118 : vector<8x128xf32>
    %121 = arith.divf %119, %120 : vector<8x128xf32>
    %122 = math.tanh %116 : vector<8x128xf32>
    %123 = vector.extract_strided_slice %121 {offsets = [0, 0], sizes = [8, 32], strides = [1, 1]} : vector<8x128xf32> to vector<8x32xf32>
    %124 = vector.extract_strided_slice %121 {offsets = [0, 32], sizes = [8, 32], strides = [1, 1]} : vector<8x128xf32> to vector<8x32xf32>
    %125 = vector.extract_strided_slice %122 {offsets = [0, 64], sizes = [8, 32], strides = [1, 1]} : vector<8x128xf32> to vector<8x32xf32>
    %126 = vector.extract_strided_slice %121 {offsets = [0, 96], sizes = [8, 32], strides = [1, 1]} : vector<8x128xf32> to vector<8x32xf32>
    %127 = arith.mulf %124, %109 : vector<8x32xf32>
    %128 = arith.mulf %123, %125 : vector<8x32xf32>
    %129 = arith.addf %127, %128 : vector<8x32xf32>
    %130 = math.tanh %129 : vector<8x32xf32>
    %131 = arith.mulf %126, %130 : vector<8x32xf32>
    %c3 = arith.constant 3 : index
    %c0_23 = arith.constant 0 : index
    %c0_24 = arith.constant 0 : index
    %132 = vector.load %arg6[%c3, %c0_23, %c0_24] : memref<8x8x32xf32, #tpu.memory_space<vmem>>, vector<1x8x32xf32>
    %133 = vector.shape_cast %132 : vector<1x8x32xf32> to vector<8x32xf32>
    %134 = vector.shape_cast %131 : vector<8x32xf32> to vector<1x8x32xf32>
    tpu.vector_store %arg6[%c3, %c0_23, %c0_24], %134 {strides = array<i32>} : memref<8x8x32xf32, #tpu.memory_space<vmem>>, vector<1x8x32xf32>,
    %cst_25 = arith.constant dense<0.000000e+00> : vector<8x128xf32>
    %135 = tpu.matmul %131, %0, %cst_25 {dimension_numbers = #tpu.dot_dimension_numbers<[1], [0], [0], [1], [0, 0, 1, 1], [], []>} : vector<8x32xf32>, vector<32x128xf32>, vector<8x128xf32> -> vector<8x128xf32>
    %136 = arith.addf %135, %34 : vector<8x128xf32>
    %137 = arith.negf %136 : vector<8x128xf32>
    %138 = math.exp %137 : vector<8x128xf32>
    %cst_26 = arith.constant 1.000000e+00 : f32
    %139 = vector.broadcast %cst_26 : f32 to vector<8x128xf32>
    %140 = arith.addf %139, %138 : vector<8x128xf32>
    %141 = arith.divf %139, %140 : vector<8x128xf32>
    %142 = math.tanh %136 : vector<8x128xf32>
    %143 = vector.extract_strided_slice %141 {offsets = [0, 0], sizes = [8, 32], strides = [1, 1]} : vector<8x128xf32> to vector<8x32xf32>
    %144 = vector.extract_strided_slice %141 {offsets = [0, 32], sizes = [8, 32], strides = [1, 1]} : vector<8x128xf32> to vector<8x32xf32>
    %145 = vector.extract_strided_slice %142 {offsets = [0, 64], sizes = [8, 32], strides = [1, 1]} : vector<8x128xf32> to vector<8x32xf32>
    %146 = vector.extract_strided_slice %141 {offsets = [0, 96], sizes = [8, 32], strides = [1, 1]} : vector<8x128xf32> to vector<8x32xf32>
    %147 = arith.mulf %144, %129 : vector<8x32xf32>
    %148 = arith.mulf %143, %145 : vector<8x32xf32>
    %149 = arith.addf %147, %148 : vector<8x32xf32>
    %150 = math.tanh %149 : vector<8x32xf32>
    %151 = arith.mulf %146, %150 : vector<8x32xf32>
    %c4 = arith.constant 4 : index
    %c0_27 = arith.constant 0 : index
    %c0_28 = arith.constant 0 : index
    %152 = vector.load %arg6[%c4, %c0_27, %c0_28] : memref<8x8x32xf32, #tpu.memory_space<vmem>>, vector<1x8x32xf32>
    %153 = vector.shape_cast %152 : vector<1x8x32xf32> to vector<8x32xf32>
    %154 = vector.shape_cast %151 : vector<8x32xf32> to vector<1x8x32xf32>
    tpu.vector_store %arg6[%c4, %c0_27, %c0_28], %154 {strides = array<i32>} : memref<8x8x32xf32, #tpu.memory_space<vmem>>, vector<1x8x32xf32>,
    %cst_29 = arith.constant dense<0.000000e+00> : vector<8x128xf32>
    %155 = tpu.matmul %151, %0, %cst_29 {dimension_numbers = #tpu.dot_dimension_numbers<[1], [0], [0], [1], [0, 0, 1, 1], [], []>} : vector<8x32xf32>, vector<32x128xf32>, vector<8x128xf32> -> vector<8x128xf32>
    %156 = arith.addf %155, %40 : vector<8x128xf32>
    %157 = arith.negf %156 : vector<8x128xf32>
    %158 = math.exp %157 : vector<8x128xf32>
    %cst_30 = arith.constant 1.000000e+00 : f32
    %159 = vector.broadcast %cst_30 : f32 to vector<8x128xf32>
    %160 = arith.addf %159, %158 : vector<8x128xf32>
    %161 = arith.divf %159, %160 : vector<8x128xf32>
    %162 = math.tanh %156 : vector<8x128xf32>
    %163 = vector.extract_strided_slice %161 {offsets = [0, 0], sizes = [8, 32], strides = [1, 1]} : vector<8x128xf32> to vector<8x32xf32>
    %164 = vector.extract_strided_slice %161 {offsets = [0, 32], sizes = [8, 32], strides = [1, 1]} : vector<8x128xf32> to vector<8x32xf32>
    %165 = vector.extract_strided_slice %162 {offsets = [0, 64], sizes = [8, 32], strides = [1, 1]} : vector<8x128xf32> to vector<8x32xf32>
    %166 = vector.extract_strided_slice %161 {offsets = [0, 96], sizes = [8, 32], strides = [1, 1]} : vector<8x128xf32> to vector<8x32xf32>
    %167 = arith.mulf %164, %149 : vector<8x32xf32>
    %168 = arith.mulf %163, %165 : vector<8x32xf32>
    %169 = arith.addf %167, %168 : vector<8x32xf32>
    %170 = math.tanh %169 : vector<8x32xf32>
    %171 = arith.mulf %166, %170 : vector<8x32xf32>
    %c5 = arith.constant 5 : index
    %c0_31 = arith.constant 0 : index
    %c0_32 = arith.constant 0 : index
    %172 = vector.load %arg6[%c5, %c0_31, %c0_32] : memref<8x8x32xf32, #tpu.memory_space<vmem>>, vector<1x8x32xf32>
    %173 = vector.shape_cast %172 : vector<1x8x32xf32> to vector<8x32xf32>
    %174 = vector.shape_cast %171 : vector<8x32xf32> to vector<1x8x32xf32>
    tpu.vector_store %arg6[%c5, %c0_31, %c0_32], %174 {strides = array<i32>} : memref<8x8x32xf32, #tpu.memory_space<vmem>>, vector<1x8x32xf32>,
    %cst_33 = arith.constant dense<0.000000e+00> : vector<8x128xf32>
    %175 = tpu.matmul %171, %0, %cst_33 {dimension_numbers = #tpu.dot_dimension_numbers<[1], [0], [0], [1], [0, 0, 1, 1], [], []>} : vector<8x32xf32>, vector<32x128xf32>, vector<8x128xf32> -> vector<8x128xf32>
    %176 = arith.addf %175, %46 : vector<8x128xf32>
    %177 = arith.negf %176 : vector<8x128xf32>
    %178 = math.exp %177 : vector<8x128xf32>
    %cst_34 = arith.constant 1.000000e+00 : f32
    %179 = vector.broadcast %cst_34 : f32 to vector<8x128xf32>
    %180 = arith.addf %179, %178 : vector<8x128xf32>
    %181 = arith.divf %179, %180 : vector<8x128xf32>
    %182 = math.tanh %176 : vector<8x128xf32>
    %183 = vector.extract_strided_slice %181 {offsets = [0, 0], sizes = [8, 32], strides = [1, 1]} : vector<8x128xf32> to vector<8x32xf32>
    %184 = vector.extract_strided_slice %181 {offsets = [0, 32], sizes = [8, 32], strides = [1, 1]} : vector<8x128xf32> to vector<8x32xf32>
    %185 = vector.extract_strided_slice %182 {offsets = [0, 64], sizes = [8, 32], strides = [1, 1]} : vector<8x128xf32> to vector<8x32xf32>
    %186 = vector.extract_strided_slice %181 {offsets = [0, 96], sizes = [8, 32], strides = [1, 1]} : vector<8x128xf32> to vector<8x32xf32>
    %187 = arith.mulf %184, %169 : vector<8x32xf32>
    %188 = arith.mulf %183, %185 : vector<8x32xf32>
    %189 = arith.addf %187, %188 : vector<8x32xf32>
    %190 = math.tanh %189 : vector<8x32xf32>
    %191 = arith.mulf %186, %190 : vector<8x32xf32>
    %c6 = arith.constant 6 : index
    %c0_35 = arith.constant 0 : index
    %c0_36 = arith.constant 0 : index
    %192 = vector.load %arg6[%c6, %c0_35, %c0_36] : memref<8x8x32xf32, #tpu.memory_space<vmem>>, vector<1x8x32xf32>
    %193 = vector.shape_cast %192 : vector<1x8x32xf32> to vector<8x32xf32>
    %194 = vector.shape_cast %191 : vector<8x32xf32> to vector<1x8x32xf32>
    tpu.vector_store %arg6[%c6, %c0_35, %c0_36], %194 {strides = array<i32>} : memref<8x8x32xf32, #tpu.memory_space<vmem>>, vector<1x8x32xf32>,
    %cst_37 = arith.constant dense<0.000000e+00> : vector<8x128xf32>
    %195 = tpu.matmul %191, %0, %cst_37 {dimension_numbers = #tpu.dot_dimension_numbers<[1], [0], [0], [1], [0, 0, 1, 1], [], []>} : vector<8x32xf32>, vector<32x128xf32>, vector<8x128xf32> -> vector<8x128xf32>
    %196 = arith.addf %195, %52 : vector<8x128xf32>
    %197 = arith.negf %196 : vector<8x128xf32>
    %198 = math.exp %197 : vector<8x128xf32>
    %cst_38 = arith.constant 1.000000e+00 : f32
    %199 = vector.broadcast %cst_38 : f32 to vector<8x128xf32>
    %200 = arith.addf %199, %198 : vector<8x128xf32>
    %201 = arith.divf %199, %200 : vector<8x128xf32>
    %202 = math.tanh %196 : vector<8x128xf32>
    %203 = vector.extract_strided_slice %201 {offsets = [0, 0], sizes = [8, 32], strides = [1, 1]} : vector<8x128xf32> to vector<8x32xf32>
    %204 = vector.extract_strided_slice %201 {offsets = [0, 32], sizes = [8, 32], strides = [1, 1]} : vector<8x128xf32> to vector<8x32xf32>
    %205 = vector.extract_strided_slice %202 {offsets = [0, 64], sizes = [8, 32], strides = [1, 1]} : vector<8x128xf32> to vector<8x32xf32>
    %206 = vector.extract_strided_slice %201 {offsets = [0, 96], sizes = [8, 32], strides = [1, 1]} : vector<8x128xf32> to vector<8x32xf32>
    %207 = arith.mulf %204, %189 : vector<8x32xf32>
    %208 = arith.mulf %203, %205 : vector<8x32xf32>
    %209 = arith.addf %207, %208 : vector<8x32xf32>
    %210 = math.tanh %209 : vector<8x32xf32>
    %211 = arith.mulf %206, %210 : vector<8x32xf32>
    %c7 = arith.constant 7 : index
    %c0_39 = arith.constant 0 : index
    %c0_40 = arith.constant 0 : index
    %212 = vector.load %arg6[%c7, %c0_39, %c0_40] : memref<8x8x32xf32, #tpu.memory_space<vmem>>, vector<1x8x32xf32>
    %213 = vector.shape_cast %212 : vector<1x8x32xf32> to vector<8x32xf32>
    %214 = vector.shape_cast %211 : vector<8x32xf32> to vector<1x8x32xf32>
    tpu.vector_store %arg6[%c7, %c0_39, %c0_40], %214 {strides = array<i32>} : memref<8x8x32xf32, #tpu.memory_space<vmem>>, vector<1x8x32xf32>,
    %c8 = arith.constant 8 : index
    %215 = memref.load %arg4[%c8] : memref<9xf32, #tpu.memory_space<smem>>
    %c0_41 = arith.constant 0 : index
    %c0_42 = arith.constant 0 : index
    %c0_43 = arith.constant 0 : index
    %216 = vector.load %arg6[%c0_41, %c0_42, %c0_43] : memref<8x8x32xf32, #tpu.memory_space<vmem>>, vector<8x8x32xf32>
    %217 = vector.shape_cast %3 : vector<1x32xf32> to vector<1x1x32xf32>
    %218 = vector.broadcast %217 : vector<1x1x32xf32> to vector<8x8x32xf32>
    %219 = arith.mulf %216, %218 : vector<8x8x32xf32>
    %cst_44 = arith.constant dense<0.000000e+00> : vector<8x8xf32>
    %220 = vector.multi_reduction <add>, %219, %cst_44 [2] : vector<8x8x32xf32> to vector<8x8xf32>
    %221 = vector.broadcast %215 : f32 to vector<8x8xf32>
    %222 = arith.addf %220, %221 : vector<8x8xf32>
    %223 = arith.negf %222 : vector<8x8xf32>
    %224 = math.exp %223 : vector<8x8xf32>
    %cst_45 = arith.constant 1.000000e+00 : f32
    %225 = vector.broadcast %cst_45 : f32 to vector<8x8xf32>
    %226 = arith.addf %225, %224 : vector<8x8xf32>
    %227 = arith.divf %225, %226 : vector<8x8xf32>
    %cst_46 = arith.constant 1.000000e+00 : f32
    %228 = vector.broadcast %cst_46 : f32 to vector<8x8xf32>
    %229 = arith.subf %228, %227 : vector<8x8xf32>
    %c0_47 = arith.constant 0 : index
    %c0_48 = arith.constant 0 : index
    %230 = vector.load %arg2[%c0_47, %c0_48] : memref<16x8xf32, #tpu.memory_space<vmem>>, vector<8x8xf32>
    %c8_49 = arith.constant 8 : index
    %c0_50 = arith.constant 0 : index
    %231 = vector.load %arg2[%c8_49, %c0_50] : memref<16x8xf32, #tpu.memory_space<vmem>>, vector<8x8xf32>
    %c0_51 = arith.constant 0 : index
    %232 = memref.load %arg4[%c0_51] : memref<9xf32, #tpu.memory_space<smem>>
    %c1_52 = arith.constant 1 : index
    %233 = memref.load %arg4[%c1_52] : memref<9xf32, #tpu.memory_space<smem>>
    %c2_53 = arith.constant 2 : index
    %234 = memref.load %arg4[%c2_53] : memref<9xf32, #tpu.memory_space<smem>>
    %c3_54 = arith.constant 3 : index
    %235 = memref.load %arg4[%c3_54] : memref<9xf32, #tpu.memory_space<smem>>
    %c4_55 = arith.constant 4 : index
    %236 = memref.load %arg4[%c4_55] : memref<9xf32, #tpu.memory_space<smem>>
    %c5_56 = arith.constant 5 : index
    %237 = memref.load %arg4[%c5_56] : memref<9xf32, #tpu.memory_space<smem>>
    %c6_57 = arith.constant 6 : index
    %238 = memref.load %arg4[%c6_57] : memref<9xf32, #tpu.memory_space<smem>>
    %c7_58 = arith.constant 7 : index
    %239 = memref.load %arg4[%c7_58] : memref<9xf32, #tpu.memory_space<smem>>
    %cst_59 = arith.constant 1.000000e+00 : f32
    %240 = vector.broadcast %cst_59 : f32 to vector<8x8xf32>
    %241 = arith.subf %240, %230 : vector<8x8xf32>
    %242 = arith.mulf %229, %241 : vector<8x8xf32>
    %243 = arith.mulf %227, %230 : vector<8x8xf32>
    %244 = arith.addf %242, %243 : vector<8x8xf32>
    %245 = vector.extract_strided_slice %230 {offsets = [0, 0], sizes = [7, 8], strides = [1, 1]} : vector<8x8xf32> to vector<7x8xf32>
    %246 = vector.extract_strided_slice %230 {offsets = [1, 0], sizes = [7, 8], strides = [1, 1]} : vector<8x8xf32> to vector<7x8xf32>
    %cst_60 = arith.constant 1.000000e+00 : f32
    %247 = vector.broadcast %cst_60 : f32 to vector<7x8xf32>
    %248 = arith.subf %247, %245 : vector<7x8xf32>
    %249 = vector.broadcast %236 : f32 to vector<7x8xf32>
    %250 = arith.mulf %249, %248 : vector<7x8xf32>
    %cst_61 = arith.constant 1.000000e+00 : f32
    %251 = vector.broadcast %cst_61 : f32 to vector<7x8xf32>
    %252 = arith.subf %251, %246 : vector<7x8xf32>
    %253 = arith.mulf %250, %252 : vector<7x8xf32>
    %cst_62 = arith.constant 1.000000e+00 : f32
    %254 = vector.broadcast %cst_62 : f32 to vector<7x8xf32>
    %255 = arith.subf %254, %245 : vector<7x8xf32>
    %256 = vector.broadcast %237 : f32 to vector<7x8xf32>
    %257 = arith.mulf %256, %255 : vector<7x8xf32>
    %258 = arith.mulf %257, %246 : vector<7x8xf32>
    %259 = arith.addf %253, %258 : vector<7x8xf32>
    %260 = vector.broadcast %238 : f32 to vector<7x8xf32>
    %261 = arith.mulf %260, %245 : vector<7x8xf32>
    %cst_63 = arith.constant 1.000000e+00 : f32
    %262 = vector.broadcast %cst_63 : f32 to vector<7x8xf32>
    %263 = arith.subf %262, %246 : vector<7x8xf32>
    %264 = arith.mulf %261, %263 : vector<7x8xf32>
    %265 = arith.addf %259, %264 : vector<7x8xf32>
    %266 = vector.broadcast %239 : f32 to vector<7x8xf32>
    %267 = arith.mulf %266, %245 : vector<7x8xf32>
    %268 = arith.mulf %267, %246 : vector<7x8xf32>
    %269 = arith.addf %265, %268 : vector<7x8xf32>
    %270 = vector.extract_strided_slice %230 {offsets = [0, 0], sizes = [1, 8], strides = [1, 1]} : vector<8x8xf32> to vector<1x8xf32>
    %cst_64 = arith.constant 1.000000e+00 : f32
    %271 = vector.broadcast %cst_64 : f32 to vector<1x8xf32>
    %272 = arith.subf %271, %270 : vector<1x8xf32>
    %273 = vector.broadcast %232 : f32 to vector<1x8xf32>
    %274 = arith.mulf %273, %272 : vector<1x8xf32>
    %275 = vector.extract_strided_slice %230 {offsets = [0, 0], sizes = [1, 8], strides = [1, 1]} : vector<8x8xf32> to vector<1x8xf32>
    %276 = vector.broadcast %233 : f32 to vector<1x8xf32>
    %277 = arith.mulf %276, %275 : vector<1x8xf32>
    %278 = arith.addf %274, %277 : vector<1x8xf32>
    %279 = vector.extract_strided_slice %244 {offsets = [1, 0], sizes = [7, 8], strides = [1, 1]} : vector<8x8xf32> to vector<7x8xf32>
    %280 = arith.addf %269, %279 : vector<7x8xf32>
    %281 = vector.extract_strided_slice %231 {offsets = [1, 0], sizes = [7, 8], strides = [1, 1]} : vector<8x8xf32> to vector<7x8xf32>
    %282 = arith.mulf %280, %281 : vector<7x8xf32>
    %cst_65 = arith.constant dense<0.000000e+00> : vector<8xf32>
    %283 = vector.multi_reduction <add>, %282, %cst_65 [0] : vector<7x8xf32> to vector<8xf32>
    %284 = vector.shape_cast %283 : vector<8xf32> to vector<1x8xf32>
    %285 = vector.extract_strided_slice %230 {offsets = [0, 0], sizes = [7, 8], strides = [1, 1]} : vector<8x8xf32> to vector<7x8xf32>
    %286 = vector.extract_strided_slice %231 {offsets = [0, 0], sizes = [7, 8], strides = [1, 1]} : vector<8x8xf32> to vector<7x8xf32>
    %287 = vector.extract_strided_slice %231 {offsets = [1, 0], sizes = [7, 8], strides = [1, 1]} : vector<8x8xf32> to vector<7x8xf32>
    %288 = arith.subf %286, %287 : vector<7x8xf32>
    %289 = arith.mulf %285, %288 : vector<7x8xf32>
    %cst_66 = arith.constant dense<0.000000e+00> : vector<8xf32>
    %290 = vector.multi_reduction <add>, %289, %cst_66 [0] : vector<7x8xf32> to vector<8xf32>
    %291 = vector.shape_cast %290 : vector<8xf32> to vector<1x8xf32>
    %292 = vector.extract_strided_slice %230 {offsets = [7, 0], sizes = [1, 8], strides = [1, 1]} : vector<8x8xf32> to vector<1x8xf32>
    %293 = vector.extract_strided_slice %231 {offsets = [7, 0], sizes = [1, 8], strides = [1, 1]} : vector<8x8xf32> to vector<1x8xf32>
    %294 = arith.mulf %292, %293 : vector<1x8xf32>
    %295 = arith.addf %291, %294 : vector<1x8xf32>
    %cst_67 = arith.constant 1.000000e+00 : f32
    %296 = vector.broadcast %cst_67 : f32 to vector<1x8xf32>
    %297 = arith.subf %296, %295 : vector<1x8xf32>
    %298 = vector.broadcast %234 : f32 to vector<1x8xf32>
    %299 = arith.mulf %298, %297 : vector<1x8xf32>
    %300 = vector.broadcast %235 : f32 to vector<1x8xf32>
    %301 = arith.mulf %300, %295 : vector<1x8xf32>
    %302 = arith.addf %299, %301 : vector<1x8xf32>
    %303 = vector.extract_strided_slice %244 {offsets = [0, 0], sizes = [1, 8], strides = [1, 1]} : vector<8x8xf32> to vector<1x8xf32>
    %304 = arith.addf %278, %303 : vector<1x8xf32>
    %305 = arith.addf %304, %284 : vector<1x8xf32>
    %306 = arith.addf %305, %302 : vector<1x8xf32>
    %307 = vector.broadcast %236 : f32 to vector<1x8xf32>
    %308 = vector.broadcast %237 : f32 to vector<1x8xf32>
    %309 = tpu.concatenate %307, %308 in 0 : vector<1x8xf32>, vector<1x8xf32> -> vector<2x8xf32>
    %310 = vector.broadcast %238 : f32 to vector<1x8xf32>
    %311 = vector.broadcast %239 : f32 to vector<1x8xf32>
    %312 = tpu.concatenate %310, %311 in 0 : vector<1x8xf32>, vector<1x8xf32> -> vector<2x8xf32>
    %313 = vector.broadcast %232 : f32 to vector<1x8xf32>
    %314 = vector.broadcast %233 : f32 to vector<1x8xf32>
    %315 = tpu.concatenate %313, %314 in 0 : vector<1x8xf32>, vector<1x8xf32> -> vector<2x8xf32>
    %316 = vector.broadcast %234 : f32 to vector<1x8xf32>
    %317 = vector.broadcast %235 : f32 to vector<1x8xf32>
    %318 = tpu.concatenate %316, %317 in 0 : vector<1x8xf32>, vector<1x8xf32> -> vector<2x8xf32>
    %319 = vector.extract_strided_slice %229 {offsets = [0, 0], sizes = [1, 8], strides = [1, 1]} : vector<8x8xf32> to vector<1x8xf32>
    %320 = vector.extract_strided_slice %227 {offsets = [0, 0], sizes = [1, 8], strides = [1, 1]} : vector<8x8xf32> to vector<1x8xf32>
    %321 = tpu.concatenate %319, %320 in 0 : vector<1x8xf32>, vector<1x8xf32> -> vector<2x8xf32>
    %322 = arith.addf %315, %321 : vector<2x8xf32>
    %323 = vector.extract_strided_slice %231 {offsets = [1, 0], sizes = [1, 8], strides = [1, 1]} : vector<8x8xf32> to vector<1x8xf32>
    %324 = vector.extract_strided_slice %322 {offsets = [0, 0], sizes = [1, 8], strides = [1, 1]} : vector<2x8xf32> to vector<1x8xf32>
    %325 = vector.broadcast %324 : vector<1x8xf32> to vector<2x8xf32>
    %326 = arith.addf %325, %309 : vector<2x8xf32>
    %327 = vector.extract_strided_slice %322 {offsets = [1, 0], sizes = [1, 8], strides = [1, 1]} : vector<2x8xf32> to vector<1x8xf32>
    %328 = vector.broadcast %327 : vector<1x8xf32> to vector<2x8xf32>
    %329 = arith.addf %328, %312 : vector<2x8xf32>
    %330 = arith.maximumf %326, %329 : vector<2x8xf32>
    %331 = arith.minimumf %326, %329 : vector<2x8xf32>
    %332 = arith.subf %331, %330 : vector<2x8xf32>
    %333 = math.exp %332 : vector<2x8xf32>
    %334 = math.log1p %333 : vector<2x8xf32>
    %335 = arith.addf %330, %334 : vector<2x8xf32>
    %336 = vector.extract_strided_slice %229 {offsets = [1, 0], sizes = [1, 8], strides = [1, 1]} : vector<8x8xf32> to vector<1x8xf32>
    %337 = vector.extract_strided_slice %227 {offsets = [1, 0], sizes = [1, 8], strides = [1, 1]} : vector<8x8xf32> to vector<1x8xf32>
    %338 = tpu.concatenate %336, %337 in 0 : vector<1x8xf32>, vector<1x8xf32> -> vector<2x8xf32>
    %339 = arith.addf %335, %338 : vector<2x8xf32>
    %cst_68 = arith.constant 0.000000e+00 : f32
    %340 = vector.broadcast %cst_68 : f32 to vector<1x8xf32>
    %341 = arith.cmpf ogt, %323, %340 : vector<1x8xf32>
    %342 = vector.shape_cast %341 : vector<1x8xi1> to vector<1x8xi1>
    %343 = vector.broadcast %342 : vector<1x8xi1> to vector<2x8xi1>
    %344 = arith.select %343, %339, %322 : vector<2x8xi1>, vector<2x8xf32>
    %345 = vector.extract_strided_slice %231 {offsets = [2, 0], sizes = [1, 8], strides = [1, 1]} : vector<8x8xf32> to vector<1x8xf32>
    %346 = vector.extract_strided_slice %344 {offsets = [0, 0], sizes = [1, 8], strides = [1, 1]} : vector<2x8xf32> to vector<1x8xf32>
    %347 = vector.broadcast %346 : vector<1x8xf32> to vector<2x8xf32>
    %348 = arith.addf %347, %309 : vector<2x8xf32>
    %349 = vector.extract_strided_slice %344 {offsets = [1, 0], sizes = [1, 8], strides = [1, 1]} : vector<2x8xf32> to vector<1x8xf32>
    %350 = vector.broadcast %349 : vector<1x8xf32> to vector<2x8xf32>
    %351 = arith.addf %350, %312 : vector<2x8xf32>
    %352 = arith.maximumf %348, %351 : vector<2x8xf32>
    %353 = arith.minimumf %348, %351 : vector<2x8xf32>
    %354 = arith.subf %353, %352 : vector<2x8xf32>
    %355 = math.exp %354 : vector<2x8xf32>
    %356 = math.log1p %355 : vector<2x8xf32>
    %357 = arith.addf %352, %356 : vector<2x8xf32>
    %358 = vector.extract_strided_slice %229 {offsets = [2, 0], sizes = [1, 8], strides = [1, 1]} : vector<8x8xf32> to vector<1x8xf32>
    %359 = vector.extract_strided_slice %227 {offsets = [2, 0], sizes = [1, 8], strides = [1, 1]} : vector<8x8xf32> to vector<1x8xf32>
    %360 = tpu.concatenate %358, %359 in 0 : vector<1x8xf32>, vector<1x8xf32> -> vector<2x8xf32>
    %361 = arith.addf %357, %360 : vector<2x8xf32>
    %cst_69 = arith.constant 0.000000e+00 : f32
    %362 = vector.broadcast %cst_69 : f32 to vector<1x8xf32>
    %363 = arith.cmpf ogt, %345, %362 : vector<1x8xf32>
    %364 = vector.shape_cast %363 : vector<1x8xi1> to vector<1x8xi1>
    %365 = vector.broadcast %364 : vector<1x8xi1> to vector<2x8xi1>
    %366 = arith.select %365, %361, %344 : vector<2x8xi1>, vector<2x8xf32>
    %367 = vector.extract_strided_slice %231 {offsets = [3, 0], sizes = [1, 8], strides = [1, 1]} : vector<8x8xf32> to vector<1x8xf32>
    %368 = vector.extract_strided_slice %366 {offsets = [0, 0], sizes = [1, 8], strides = [1, 1]} : vector<2x8xf32> to vector<1x8xf32>
    %369 = vector.broadcast %368 : vector<1x8xf32> to vector<2x8xf32>
    %370 = arith.addf %369, %309 : vector<2x8xf32>
    %371 = vector.extract_strided_slice %366 {offsets = [1, 0], sizes = [1, 8], strides = [1, 1]} : vector<2x8xf32> to vector<1x8xf32>
    %372 = vector.broadcast %371 : vector<1x8xf32> to vector<2x8xf32>
    %373 = arith.addf %372, %312 : vector<2x8xf32>
    %374 = arith.maximumf %370, %373 : vector<2x8xf32>
    %375 = arith.minimumf %370, %373 : vector<2x8xf32>
    %376 = arith.subf %375, %374 : vector<2x8xf32>
    %377 = math.exp %376 : vector<2x8xf32>
    %378 = math.log1p %377 : vector<2x8xf32>
    %379 = arith.addf %374, %378 : vector<2x8xf32>
    %380 = vector.extract_strided_slice %229 {offsets = [3, 0], sizes = [1, 8], strides = [1, 1]} : vector<8x8xf32> to vector<1x8xf32>
    %381 = vector.extract_strided_slice %227 {offsets = [3, 0], sizes = [1, 8], strides = [1, 1]} : vector<8x8xf32> to vector<1x8xf32>
    %382 = tpu.concatenate %380, %381 in 0 : vector<1x8xf32>, vector<1x8xf32> -> vector<2x8xf32>
    %383 = arith.addf %379, %382 : vector<2x8xf32>
    %cst_70 = arith.constant 0.000000e+00 : f32
    %384 = vector.broadcast %cst_70 : f32 to vector<1x8xf32>
    %385 = arith.cmpf ogt, %367, %384 : vector<1x8xf32>
    %386 = vector.shape_cast %385 : vector<1x8xi1> to vector<1x8xi1>
    %387 = vector.broadcast %386 : vector<1x8xi1> to vector<2x8xi1>
    %388 = arith.select %387, %383, %366 : vector<2x8xi1>, vector<2x8xf32>
    %389 = vector.extract_strided_slice %231 {offsets = [4, 0], sizes = [1, 8], strides = [1, 1]} : vector<8x8xf32> to vector<1x8xf32>
    %390 = vector.extract_strided_slice %388 {offsets = [0, 0], sizes = [1, 8], strides = [1, 1]} : vector<2x8xf32> to vector<1x8xf32>
    %391 = vector.broadcast %390 : vector<1x8xf32> to vector<2x8xf32>
    %392 = arith.addf %391, %309 : vector<2x8xf32>
    %393 = vector.extract_strided_slice %388 {offsets = [1, 0], sizes = [1, 8], strides = [1, 1]} : vector<2x8xf32> to vector<1x8xf32>
    %394 = vector.broadcast %393 : vector<1x8xf32> to vector<2x8xf32>
    %395 = arith.addf %394, %312 : vector<2x8xf32>
    %396 = arith.maximumf %392, %395 : vector<2x8xf32>
    %397 = arith.minimumf %392, %395 : vector<2x8xf32>
    %398 = arith.subf %397, %396 : vector<2x8xf32>
    %399 = math.exp %398 : vector<2x8xf32>
    %400 = math.log1p %399 : vector<2x8xf32>
    %401 = arith.addf %396, %400 : vector<2x8xf32>
    %402 = vector.extract_strided_slice %229 {offsets = [4, 0], sizes = [1, 8], strides = [1, 1]} : vector<8x8xf32> to vector<1x8xf32>
    %403 = vector.extract_strided_slice %227 {offsets = [4, 0], sizes = [1, 8], strides = [1, 1]} : vector<8x8xf32> to vector<1x8xf32>
    %404 = tpu.concatenate %402, %403 in 0 : vector<1x8xf32>, vector<1x8xf32> -> vector<2x8xf32>
    %405 = arith.addf %401, %404 : vector<2x8xf32>
    %cst_71 = arith.constant 0.000000e+00 : f32
    %406 = vector.broadcast %cst_71 : f32 to vector<1x8xf32>
    %407 = arith.cmpf ogt, %389, %406 : vector<1x8xf32>
    %408 = vector.shape_cast %407 : vector<1x8xi1> to vector<1x8xi1>
    %409 = vector.broadcast %408 : vector<1x8xi1> to vector<2x8xi1>
    %410 = arith.select %409, %405, %388 : vector<2x8xi1>, vector<2x8xf32>
    %411 = vector.extract_strided_slice %231 {offsets = [5, 0], sizes = [1, 8], strides = [1, 1]} : vector<8x8xf32> to vector<1x8xf32>
    %412 = vector.extract_strided_slice %410 {offsets = [0, 0], sizes = [1, 8], strides = [1, 1]} : vector<2x8xf32> to vector<1x8xf32>
    %413 = vector.broadcast %412 : vector<1x8xf32> to vector<2x8xf32>
    %414 = arith.addf %413, %309 : vector<2x8xf32>
    %415 = vector.extract_strided_slice %410 {offsets = [1, 0], sizes = [1, 8], strides = [1, 1]} : vector<2x8xf32> to vector<1x8xf32>
    %416 = vector.broadcast %415 : vector<1x8xf32> to vector<2x8xf32>
    %417 = arith.addf %416, %312 : vector<2x8xf32>
    %418 = arith.maximumf %414, %417 : vector<2x8xf32>
    %419 = arith.minimumf %414, %417 : vector<2x8xf32>
    %420 = arith.subf %419, %418 : vector<2x8xf32>
    %421 = math.exp %420 : vector<2x8xf32>
    %422 = math.log1p %421 : vector<2x8xf32>
    %423 = arith.addf %418, %422 : vector<2x8xf32>
    %424 = vector.extract_strided_slice %229 {offsets = [5, 0], sizes = [1, 8], strides = [1, 1]} : vector<8x8xf32> to vector<1x8xf32>
    %425 = vector.extract_strided_slice %227 {offsets = [5, 0], sizes = [1, 8], strides = [1, 1]} : vector<8x8xf32> to vector<1x8xf32>
    %426 = tpu.concatenate %424, %425 in 0 : vector<1x8xf32>, vector<1x8xf32> -> vector<2x8xf32>
    %427 = arith.addf %423, %426 : vector<2x8xf32>
    %cst_72 = arith.constant 0.000000e+00 : f32
    %428 = vector.broadcast %cst_72 : f32 to vector<1x8xf32>
    %429 = arith.cmpf ogt, %411, %428 : vector<1x8xf32>
    %430 = vector.shape_cast %429 : vector<1x8xi1> to vector<1x8xi1>
    %431 = vector.broadcast %430 : vector<1x8xi1> to vector<2x8xi1>
    %432 = arith.select %431, %427, %410 : vector<2x8xi1>, vector<2x8xf32>
    %433 = vector.extract_strided_slice %231 {offsets = [6, 0], sizes = [1, 8], strides = [1, 1]} : vector<8x8xf32> to vector<1x8xf32>
    %434 = vector.extract_strided_slice %432 {offsets = [0, 0], sizes = [1, 8], strides = [1, 1]} : vector<2x8xf32> to vector<1x8xf32>
    %435 = vector.broadcast %434 : vector<1x8xf32> to vector<2x8xf32>
    %436 = arith.addf %435, %309 : vector<2x8xf32>
    %437 = vector.extract_strided_slice %432 {offsets = [1, 0], sizes = [1, 8], strides = [1, 1]} : vector<2x8xf32> to vector<1x8xf32>
    %438 = vector.broadcast %437 : vector<1x8xf32> to vector<2x8xf32>
    %439 = arith.addf %438, %312 : vector<2x8xf32>
    %440 = arith.maximumf %436, %439 : vector<2x8xf32>
    %441 = arith.minimumf %436, %439 : vector<2x8xf32>
    %442 = arith.subf %441, %440 : vector<2x8xf32>
    %443 = math.exp %442 : vector<2x8xf32>
    %444 = math.log1p %443 : vector<2x8xf32>
    %445 = arith.addf %440, %444 : vector<2x8xf32>
    %446 = vector.extract_strided_slice %229 {offsets = [6, 0], sizes = [1, 8], strides = [1, 1]} : vector<8x8xf32> to vector<1x8xf32>
    %447 = vector.extract_strided_slice %227 {offsets = [6, 0], sizes = [1, 8], strides = [1, 1]} : vector<8x8xf32> to vector<1x8xf32>
    %448 = tpu.concatenate %446, %447 in 0 : vector<1x8xf32>, vector<1x8xf32> -> vector<2x8xf32>
    %449 = arith.addf %445, %448 : vector<2x8xf32>
    %cst_73 = arith.constant 0.000000e+00 : f32
    %450 = vector.broadcast %cst_73 : f32 to vector<1x8xf32>
    %451 = arith.cmpf ogt, %433, %450 : vector<1x8xf32>
    %452 = vector.shape_cast %451 : vector<1x8xi1> to vector<1x8xi1>
    %453 = vector.broadcast %452 : vector<1x8xi1> to vector<2x8xi1>
    %454 = arith.select %453, %449, %432 : vector<2x8xi1>, vector<2x8xf32>
    %455 = vector.extract_strided_slice %231 {offsets = [7, 0], sizes = [1, 8], strides = [1, 1]} : vector<8x8xf32> to vector<1x8xf32>
    %456 = vector.extract_strided_slice %454 {offsets = [0, 0], sizes = [1, 8], strides = [1, 1]} : vector<2x8xf32> to vector<1x8xf32>
    %457 = vector.broadcast %456 : vector<1x8xf32> to vector<2x8xf32>
    %458 = arith.addf %457, %309 : vector<2x8xf32>
    %459 = vector.extract_strided_slice %454 {offsets = [1, 0], sizes = [1, 8], strides = [1, 1]} : vector<2x8xf32> to vector<1x8xf32>
    %460 = vector.broadcast %459 : vector<1x8xf32> to vector<2x8xf32>
    %461 = arith.addf %460, %312 : vector<2x8xf32>
    %462 = arith.maximumf %458, %461 : vector<2x8xf32>
    %463 = arith.minimumf %458, %461 : vector<2x8xf32>
    %464 = arith.subf %463, %462 : vector<2x8xf32>
    %465 = math.exp %464 : vector<2x8xf32>
    %466 = math.log1p %465 : vector<2x8xf32>
    %467 = arith.addf %462, %466 : vector<2x8xf32>
    %468 = vector.extract_strided_slice %229 {offsets = [7, 0], sizes = [1, 8], strides = [1, 1]} : vector<8x8xf32> to vector<1x8xf32>
    %469 = vector.extract_strided_slice %227 {offsets = [7, 0], sizes = [1, 8], strides = [1, 1]} : vector<8x8xf32> to vector<1x8xf32>
    %470 = tpu.concatenate %468, %469 in 0 : vector<1x8xf32>, vector<1x8xf32> -> vector<2x8xf32>
    %471 = arith.addf %467, %470 : vector<2x8xf32>
    %cst_74 = arith.constant 0.000000e+00 : f32
    %472 = vector.broadcast %cst_74 : f32 to vector<1x8xf32>
    %473 = arith.cmpf ogt, %455, %472 : vector<1x8xf32>
    %474 = vector.shape_cast %473 : vector<1x8xi1> to vector<1x8xi1>
    %475 = vector.broadcast %474 : vector<1x8xi1> to vector<2x8xi1>
    %476 = arith.select %475, %471, %454 : vector<2x8xi1>, vector<2x8xf32>
    %477 = arith.addf %476, %318 : vector<2x8xf32>
    %478 = vector.extract_strided_slice %477 {offsets = [0, 0], sizes = [1, 8], strides = [1, 1]} : vector<2x8xf32> to vector<1x8xf32>
    %479 = vector.extract_strided_slice %477 {offsets = [1, 0], sizes = [1, 8], strides = [1, 1]} : vector<2x8xf32> to vector<1x8xf32>
    %480 = arith.maximumf %478, %479 : vector<1x8xf32>
    %481 = arith.minimumf %478, %479 : vector<1x8xf32>
    %482 = arith.subf %481, %480 : vector<1x8xf32>
    %483 = math.exp %482 : vector<1x8xf32>
    %484 = math.log1p %483 : vector<1x8xf32>
    %485 = arith.addf %480, %484 : vector<1x8xf32>
    %486 = arith.subf %306, %485 : vector<1x8xf32>
    %cst_75 = arith.constant dense<0.000000e+00> : vector<1xf32>
    %487 = vector.multi_reduction <add>, %486, %cst_75 [1] : vector<1x8xf32> to vector<1xf32>
    %488 = vector.shape_cast %487 : vector<1xf32> to vector<1x1xf32>
    %cst_76 = arith.constant 0.000000e+00 : f32
    %489 = vector.broadcast %cst_76 : f32 to vector<1x1xf32>
    %490 = arith.subf %489, %488 : vector<1x1xf32>
    %c0_77 = arith.constant 0 : index
    %c0_78 = arith.constant 0 : index
    %491 = vector.load %arg5[%c0_77, %c0_78] : memref<1x1xf32, #tpu.memory_space<vmem>>, vector<1x1xf32>
    tpu.vector_store %arg5[%c0_77, %c0_78], %490 {strides = array<i32>} : memref<1x1xf32, #tpu.memory_space<vmem>>, vector<1x1xf32>,
    return
  }
}

</mosaic_0001>

<bundles_post_ra>
// kernel: tpu_custom_call.1
= control target key start
LH: loop header
LB: loop body
LE: loop exit
PB: predicated region body
PF: predicated region fallthrough
CT: control target
= control target key end

     0   :  { %10 = vsyncpa [#allocation4], 0  ;;  %s2088_s0 = inlined_call_operand.vmem [shape: f32[8,8], index: 0, kind: input, shape index: {}]   ;;  %s2089_s1 = inlined_call_operand.vmem [shape: f32[8,32], index: 1, kind: input, shape index: {}]   ;;  %s2090_s2 = inlined_call_operand.vmem [shape: f32[16,8], index: 2, kind: input, shape index: {}]   ;;  %s2091_s3 = inlined_call_operand.hbm [shape: f32[35,128], index: 3, kind: input, shape index: {}]   ;;  %s2092_s4 = inlined_call_operand.vmem [shape: f32[9], index: 4, kind: input, shape index: {}]   ;;  %s2093_s5 = inlined_call_operand.hbm [shape: f32[1,1], index: 5, kind: output, shape index: {}]  }
   0x1   :  { %11 = vsyncpa [#allocation6], 0 }
   0x2   :  { %12 = vsyncpa [#allocation5], 0  ;;  %s23_s20 = sshll.u32 %s2091_s3, 4  ;;  %s1653_s21 = smov [#allocation3]   ;;  %s24_s20 = int_to_ptr.hbm [resolvable:$true] %s23_s20 }
   0x3   :  { %s25_s22 = sshll.u32 %s1653_s21, 4  ;;  %s37_s25 = sshll.u32 %s2092_s4, 4  ;;  %s26_s22 = int_to_ptr.vmem [resolvable:$true] %s25_s22  ;;  %s38_s25 = int_to_ptr.vmem [resolvable:$true] %s37_s25 }
   0x4   :  { %s1654_s26 = smov 128   ;;  %s1655_s27 = smov 8  }
   0x5   :  { %31 = dma.hbm_to_vmem [thread:$0]  %s24_s20, 640, %s26_s22, [#allocation4], %s1654_s26, %s1654_s26, %s1655_s27  }
   0x6   :  { %s1656_s28 = smov [#allocation7]  }
   0x7   :  { %40 = dma.vmem_to_smem %s38_s25, 16, %s1656_s28, [#allocation6]  }
   0x8   :  { %1647 = dma.done.wait [#allocation4], 640  }
   0x9   :  { %1648 = vsyncadd [#allocation4], 4294966656 }
   0xa   :  { %1649 = dma.done.wait [#allocation6], 16  }
   0xb   :  { %1650 = vsyncadd [#allocation6], 4294967280 }
   0xc   :  { %49 = sfence }
   0xd   :  { %v53_v0 = vld [vmem:[#allocation3 + $0x18] sm:$0xff]  ;;  %v52_v1 = vld [vmem:[#allocation3 + $0x10] sm:$0xff]  ;;  %v51_v2 = vld [vmem:[#allocation3 + $0x8] sm:$0xff]  ;;  %v1657_v3 = vmov 0   ;;  %vm110_vm0 = vcmask 261120   ;;  %v1660_v36 = vmov 1  }
   0xe   :  { %126 = vmatpush.msra.mxu0 %v53_v0  ;;  %1440 = vset.pattern.permute.xlu0 %v1657_v3  ;;  %v1708_v4 = vld [vmem:[%s2088_s0] sm:$0xff]  ;;  %s1658_s0 = smov 64   ;;  %s1409_s6 = sld [smem:[#allocation7 + $0x8]] }
   0xf   :  { %190 = vmatpush.msra.mxu1 %v53_v0  ;;  %255 = vmatpush.msra.mxu2 %v53_v0  ;;  %v50_v5 = vld [vmem:[#allocation3] sm:$0xff]  ;;  %s1807_s7 = sld [smem:[#allocation7]]  ;;  %s1382_s24 = sshll.u32 %s2093_s5, 4  ;;  %s1383_s24 = int_to_ptr.hbm [resolvable:$true] %s1382_s24 }
  0x10   :  { %127 = vmatpush.msra.mxu0 %v52_v1  ;;  %60 = vperm.xlu0 %1440, %v1708_v4   ;;  %v109_v6 = vld [vmem:[%s2089_s1] sm:$0xff]  ;;  %s1659_s1 = smov 32   ;;  %s1811_s8 = sld [smem:[#allocation7 + $0x1]] }
  0x11   :  { %191 = vmatpush.msra.mxu1 %v52_v1  ;;  %256 = vmatpush.msra.mxu2 %v52_v1  ;;  %v1715_v7 = vld [vmem:[#allocation3 + $0x20] ss:$0 sm:$0xff]  ;;  %v1718_v10 = vld [vmem:[#allocation3 + $0x21] ss:$0 sm:$0xff]  ;;  %s1816_s9 = sld [smem:[#allocation7 + $0x4]] }
  0x12   :  { %128 = vmatpush.msra.mxu0 %v51_v2  ;;  %320 = vmatpush.msra.mxu3 %v53_v0  ;;  %s1818_s10 = sld [smem:[#allocation7 + $0x5]] }
  0x13   :  { %192 = vmatpush.msra.mxu1 %v51_v2  ;;  %257 = vmatpush.msra.mxu2 %v51_v2  ;;  %s1823_s11 = sld [smem:[#allocation7 + $0x6]] }
  0x14   :  { %129 = vmatpush.msra.mxu0 %v50_v5  ;;  %321 = vmatpush.msra.mxu3 %v52_v1  ;;  %s1826_s12 = sld [smem:[#allocation7 + $0x7]] }
  0x15   :  { %1393 = vmatmul.msk.f32.vlgmr.msra.gmra.mxu0 %vm110_vm0, %v109_v6  ;;  %193 = vmatpush.msra.mxu1 %v50_v5  ;;  %s2025_s17 = sld [smem:[#allocation7 + $0x2]] }
  0x16   :  { %258 = vmatpush.msra.mxu2 %v50_v5  ;;  %322 = vmatpush.msra.mxu3 %v51_v2  ;;  %s2027_s18 = sld [smem:[#allocation7 + $0x3]] }
  0x17   :  { %385 = vmatpush.msrb.mxu0 %v53_v0  ;;  %450 = vmatpush.msrb.mxu1 %v53_v0 }
  0x18   :  { %323 = vmatpush.msra.mxu3 %v50_v5  ;;  %515 = vmatpush.msrb.mxu2 %v53_v0 }
  0x19   :  { %386 = vmatpush.msrb.mxu0 %v52_v1  ;;  %451 = vmatpush.msrb.mxu1 %v52_v1 }
  0x1a   :  { %516 = vmatpush.msrb.mxu2 %v52_v1  ;;  %580 = vmatpush.msrb.mxu3 %v53_v0 }
  0x1b   :  { %387 = vmatpush.msrb.mxu0 %v51_v2  ;;  %452 = vmatpush.msrb.mxu1 %v51_v2 }
  0x1c   :  { %517 = vmatpush.msrb.mxu2 %v51_v2  ;;  %581 = vmatpush.msrb.mxu3 %v52_v1  ;;  %v1661_v1 = vmov 2  }
  0x1d   :  { %388 = vmatpush.msrb.mxu0 %v50_v5  ;;  %453 = vmatpush.msrb.mxu1 %v50_v5 }
  0x1e   :  { %518 = vmatpush.msrb.mxu2 %v50_v5  ;;  %582 = vmatpush.msrb.mxu3 %v51_v2 }
  0x1f   :  { %1441 = vset.pattern.permute.xlu2 %v1660_v36  ;;  %1442 = vset.pattern.permute.xlu1 %v1661_v1 }
  0x20   :  { %583 = vmatpush.msrb.mxu3 %v50_v5 }
  0x82   :  { %v61_v8 = vpop.permute.xlu0 %60 }
  0x83   :  { %v64_v9 = vmul.f32 %v1715_v7, %v61_v8 }
  0x85   :  { %v66_v11 = vadd.f32 %v1718_v10, %v64_v9 }
  0x92   :  { %v131_v12 = vpop.f32.mrf.mxu0 }
  0x93   :  { %v132_v13 = vadd.f32 %v131_v12, %v66_v11 }
  0x95   :  { %1457 = vtanh.f32 %v132_v13  ;;  %v1394_v15 = vmul.f32 -1.442695, %v132_v13 }
  0x97   :  { %1459 = vpow2.f32 %v1394_v15 }
  0x9b   :  { %v1458_v14 = vpop.eup %1457 }
  0x9c   :  { %156 = vrot.lane.b32.xlu0 %v1458_v14, %s1658_s0 }
  0x9d   :  { %v1460_v16 = vpop.eup %1459 }
  0x9e   :  { %v137_v17 = vadd.f32 1.0, %v1460_v16 }
  0xa0   :  { %1461 = vrcp.f32 %v137_v17  ;;  %v149_v23 = vand.u32 2147483648, %v137_v17  ;;  %vm143_vm2 = vweird.f32 %v137_v17  ;;  %v147_v24 = vand.u32 2147483647, %v137_v17 }
  0xa2   :  { %v150_v26 = vor.u32 1.1754944e-38, %v149_v23  ;;  %vm148_vm4 = vcmp.eq.f32.partialorder %v147_v24, 8.507059e+37 }
  0xa6   :  { %v1462_v18 = vpop.eup %1461 }
  0xa7   :  { %v139_v19 = vmul.f32 %v1462_v18, %v137_v17  ;;  %vm144_vm1 = vweird.f32 %v1462_v18 }
  0xa8   :  { %vm145_vm3 = vmor %vm143_vm2, %vm144_vm1 }
  0xa9   :  { %v140_v20 = vsub.f32 1.0, %v139_v19 }
  0xab   :  { %v141_v21 = vmul.f32 %v1462_v18, %v140_v20 }
  0xad   :  { %v142_v22 = vadd.f32 %v1462_v18, %v141_v21 }
  0xaf   :  { %v146_v25 = vsel %vm145_vm3, %v1462_v18, %v142_v22 }
  0xb0   :  { %v151_v28 = vsel %vm148_vm4, %v150_v26, %v146_v25 }
  0xb1   :  { %v154_v30 = vmul.f32 0.0, %v151_v28 }
 0x10e   :  { %v157_v27 = vpop.permute.xlu0 %156 }
 0x10f   :  { %v159_v29 = vmul.f32 %v157_v27, %v151_v28 }
 0x111   :  { %161 = vrot.lane.b32.xlu1 %v159_v29, %s1659_s1 }
 0x183   :  { %v162_v31 = vpop.permute.xlu1 %161 }
 0x184   :  { %v164_v32 = vadd.f32 %v162_v31, %v154_v30 }
 0x186   :  { %1463 = vtanh.f32 %v164_v32 }
 0x18c   :  { %v1464_v33 = vpop.eup %1463 }
 0x18d   :  { %167 = vrot.lane.b32.xlu1 %v1464_v33, %s1658_s0  ;;  %v1663_v33 = vmov 4  }
 0x1ff   :  { %v168_v34 = vpop.permute.xlu1 %167 }
 0x200   :  { %v170_v35 = vmul.f32 %v168_v34, %v151_v28  ;;  %v1664_v34 = vmov 5  }
 0x202   :  { %172 = vrot.lane.b32.xlu2 %v170_v35, %s1659_s1  ;;  %v1665_v35 = vmov 6  }
 0x20a   :  { %68 = vperm.xlu2 %1441, %v1708_v4  }
 0x25c   :  { %v173_v37 = vpop.permute.xlu2 %172 }
 0x25d   :  { %175 = vst.msk [vmem:[#allocation2] sm:$0xff] %vm110_vm0, %v173_v37  ;;  %1395 = vmatmul.msk.f32.vlgmr.msra.gmra.mxu1 %vm110_vm0, %v173_v37 }
 0x264   :  { %v69_v38 = vpop.permute.xlu2 %68 }
 0x265   :  { %v71_v39 = vmul.f32 %v1715_v7, %v69_v38  ;;  %v1666_v38 = vmov 7  }
 0x267   :  { %v72_v40 = vadd.f32 %v1718_v10, %v71_v39 }
 0x2da   :  { %v195_v41 = vpop.f32.mrf.mxu1 }
 0x2db   :  { %v196_v42 = vadd.f32 %v195_v41, %v72_v40  ;;  %v1750_v40 = vld [vmem:[#allocation3 + $0x22] ss:$0 sm:$0xff] }
 0x2dd   :  { %1465 = vtanh.f32 %v196_v42  ;;  %v1396_v44 = vmul.f32 -1.442695, %v196_v42 }
 0x2df   :  { %1467 = vpow2.f32 %v1396_v44 }
 0x2e3   :  { %v1466_v43 = vpop.eup %1465 }
 0x2e4   :  { %220 = vrot.lane.b32.xlu0 %v1466_v43, %s1658_s0 }
 0x2e5   :  { %v1468_v45 = vpop.eup %1467 }
 0x2e6   :  { %v201_v46 = vadd.f32 1.0, %v1468_v45 }
 0x2e8   :  { %1469 = vrcp.f32 %v201_v46  ;;  %v213_v52 = vand.u32 2147483648, %v201_v46  ;;  %vm207_vm6 = vweird.f32 %v201_v46  ;;  %v211_v53 = vand.u32 2147483647, %v201_v46 }
 0x2ea   :  { %v214_v55 = vor.u32 1.1754944e-38, %v213_v52  ;;  %vm212_vm8 = vcmp.eq.f32.partialorder %v211_v53, 8.507059e+37 }
 0x2ee   :  { %v1470_v47 = vpop.eup %1469 }
 0x2ef   :  { %v203_v48 = vmul.f32 %v1470_v47, %v201_v46  ;;  %vm208_vm5 = vweird.f32 %v1470_v47 }
 0x2f0   :  { %vm209_vm7 = vmor %vm207_vm6, %vm208_vm5 }
 0x2f1   :  { %v204_v49 = vsub.f32 1.0, %v203_v48 }
 0x2f3   :  { %v205_v50 = vmul.f32 %v1470_v47, %v204_v49 }
 0x2f5   :  { %v206_v51 = vadd.f32 %v1470_v47, %v205_v50 }
 0x2f7   :  { %v210_v54 = vsel %vm209_vm7, %v1470_v47, %v206_v51 }
 0x2f8   :  { %v215_v57 = vsel %vm212_vm8, %v214_v55, %v210_v54 }
 0x2f9   :  { %v218_v59 = vmul.f32 %v215_v57, %v164_v32  ;;  %v1662_v32 = vmov 3  }
 0x2fa   :  { %1443 = vset.pattern.permute.xlu0 %v1662_v32 }
 0x356   :  { %v221_v56 = vpop.permute.xlu0 %220 }
 0x357   :  { %v223_v58 = vmul.f32 %v221_v56, %v215_v57 }
 0x359   :  { %225 = vrot.lane.b32.xlu1 %v223_v58, %s1659_s1 }
 0x361   :  { %74 = vperm.xlu1 %1442, %v1708_v4  }
 0x3cb   :  { %v226_v60 = vpop.permute.xlu1 %225 }
 0x3cc   :  { %v228_v61 = vadd.f32 %v226_v60, %v218_v59 }
 0x3ce   :  { %1471 = vtanh.f32 %v228_v61 }
 0x3d3   :  { %v75_v5 = vpop.permute.xlu1 %74 }
 0x3d4   :  { %v1472_v62 = vpop.eup %1471  ;;  %v77_v6 = vmul.f32 %v1715_v7, %v75_v5 }
 0x3d5   :  { %231 = vrot.lane.b32.xlu2 %v1472_v62, %s1658_s0 }
 0x3d6   :  { %v78_v8 = vadd.f32 %v1718_v10, %v77_v6 }
 0x42f   :  { %v232_v63 = vpop.permute.xlu2 %231 }
 0x430   :  { %v234_v0 = vmul.f32 %v232_v63, %v215_v57 }
 0x432   :  { %236 = vrot.lane.b32.xlu0 %v234_v0, %s1659_s1 }
 0x4a4   :  { %v237_v2 = vpop.permute.xlu0 %236 }
 0x4a5   :  { %240 = vst.msk [vmem:[#allocation2 + $0x8] sm:$0xff] %vm110_vm0, %v237_v2  ;;  %1397 = vmatmul.msk.f32.vlgmr.msra.gmra.mxu2 %vm110_vm0, %v237_v2 }
 0x528   :  { %v260_v9 = vpop.f32.mrf.mxu2 }
 0x529   :  { %v261_v11 = vadd.f32 %v260_v9, %v78_v8 }
 0x52b   :  { %1473 = vtanh.f32 %v261_v11  ;;  %v1398_v13 = vmul.f32 -1.442695, %v261_v11 }
 0x52d   :  { %1475 = vpow2.f32 %v1398_v13 }
 0x531   :  { %v1474_v12 = vpop.eup %1473 }
 0x532   :  { %285 = vrot.lane.b32.xlu2 %v1474_v12, %s1658_s0 }
 0x533   :  { %v1476_v14 = vpop.eup %1475 }
 0x534   :  { %v266_v15 = vadd.f32 1.0, %v1476_v14 }
 0x536   :  { %1477 = vrcp.f32 %v266_v15  ;;  %v278_v21 = vand.u32 2147483648, %v266_v15  ;;  %vm272_vm10 = vweird.f32 %v266_v15  ;;  %v276_v22 = vand.u32 2147483647, %v266_v15 }
 0x538   :  { %v279_v24 = vor.u32 1.1754944e-38, %v278_v21  ;;  %vm277_vm12 = vcmp.eq.f32.partialorder %v276_v22, 8.507059e+37 }
 0x53c   :  { %v1478_v16 = vpop.eup %1477 }
 0x53d   :  { %v268_v17 = vmul.f32 %v1478_v16, %v266_v15  ;;  %vm273_vm9 = vweird.f32 %v1478_v16 }
 0x53e   :  { %vm274_vm11 = vmor %vm272_vm10, %vm273_vm9 }
 0x53f   :  { %v269_v18 = vsub.f32 1.0, %v268_v17 }
 0x541   :  { %v270_v19 = vmul.f32 %v1478_v16, %v269_v18 }
 0x543   :  { %v271_v20 = vadd.f32 %v1478_v16, %v270_v19 }
 0x545   :  { %v275_v23 = vsel %vm274_vm11, %v1478_v16, %v271_v20 }
 0x546   :  { %v280_v26 = vsel %vm277_vm12, %v279_v24, %v275_v23 }
 0x547   :  { %v283_v28 = vmul.f32 %v280_v26, %v228_v61 }
 0x58c   :  { %v286_v25 = vpop.permute.xlu2 %285 }
 0x58d   :  { %v288_v27 = vmul.f32 %v286_v25, %v280_v26 }
 0x58f   :  { %290 = vrot.lane.b32.xlu0 %v288_v27, %s1659_s1 }
 0x597   :  { %80 = vperm.xlu0 %1443, %v1708_v4  }
 0x59f   :  { %1444 = vset.pattern.permute.xlu0 %v1663_v33 }
 0x5a0   :  { %86 = vperm.xlu0 %1444, %v1708_v4  }
 0x5a8   :  { %1445 = vset.pattern.permute.xlu0 %v1664_v34 }
 0x5a9   :  { %92 = vperm.xlu0 %1445, %v1708_v4  }
 0x5b1   :  { %1446 = vset.pattern.permute.xlu0 %v1665_v35 }
 0x5b2   :  { %98 = vperm.xlu0 %1446, %v1708_v4  }
 0x5ba   :  { %1447 = vset.pattern.permute.xlu0 %v1666_v38 }
 0x5bb   :  { %104 = vperm.xlu0 %1447, %v1708_v4  }
 0x601   :  { %v291_v29 = vpop.permute.xlu0 %290 }
 0x602   :  { %v293_v30 = vadd.f32 %v291_v29, %v283_v28 }
 0x604   :  { %1479 = vtanh.f32 %v293_v30 }
 0x609   :  { %v81_v44 = vpop.permute.xlu0 %80 }
 0x60a   :  { %v1480_v31 = vpop.eup %1479  ;;  %v83_v45 = vmul.f32 %v1715_v7, %v81_v44 }
 0x60b   :  { %296 = vrot.lane.b32.xlu1 %v1480_v31, %s1658_s0 }
 0x60c   :  { %v84_v46 = vadd.f32 %v1718_v10, %v83_v45 }
 0x612   :  { %v87_v11 = vpop.permute.xlu0 %86 }
 0x613   :  { %v89_v12 = vmul.f32 %v1715_v7, %v87_v11 }
 0x615   :  { %v90_v13 = vadd.f32 %v1718_v10, %v89_v12 }
 0x67d   :  { %v297_v36 = vpop.permute.xlu1 %296 }
 0x67e   :  { %v299_v37 = vmul.f32 %v297_v36, %v280_v26 }
 0x680   :  { %301 = vrot.lane.b32.xlu2 %v299_v37, %s1659_s1 }
 0x6da   :  { %v302_v39 = vpop.permute.xlu2 %301 }
 0x6db   :  { %305 = vst.msk [vmem:[#allocation2 + $0x10] sm:$0xff] %vm110_vm0, %v302_v39  ;;  %1399 = vmatmul.msk.f32.vlgmr.msra.gmra.mxu3 %vm110_vm0, %v302_v39 }
 0x6e2   :  { %v634_v41 = vld [vmem:[#allocation2 + $0x10] sm:$0xff] }
 0x6e3   :  { %v643_v42 = vmul.f32 %v1750_v40, %v634_v41 }
 0x6e5   :  { %v655_v43 = vsel %vm110_vm0, %v643_v42, 0.0 }
 0x6e6   :  { %656 = vadd.xlane.f32.xlu0 %v655_v43  ;;  %v93_v43 = vpop.permute.xlu0 %92 }
 0x6e7   :  { %v95_v44 = vmul.f32 %v1715_v7, %v93_v43 }
 0x6e9   :  { %v96_v45 = vadd.f32 %v1718_v10, %v95_v44 }
 0x75e   :  { %v325_v47 = vpop.f32.mrf.mxu3 }
 0x75f   :  { %v326_v4 = vadd.f32 %v325_v47, %v84_v46 }
 0x761   :  { %1481 = vtanh.f32 %v326_v4  ;;  %v1400_v49 = vmul.f32 -1.442695, %v326_v4 }
 0x763   :  { %1483 = vpow2.f32 %v1400_v49 }
 0x767   :  { %v1482_v48 = vpop.eup %1481 }
 0x768   :  { %350 = vrot.lane.b32.xlu1 %v1482_v48, %s1658_s0 }
 0x769   :  { %v1484_v50 = vpop.eup %1483 }
 0x76a   :  { %v331_v51 = vadd.f32 1.0, %v1484_v50 }
 0x76c   :  { %1485 = vrcp.f32 %v331_v51  ;;  %v343_v57 = vand.u32 2147483648, %v331_v51  ;;  %vm337_vm14 = vweird.f32 %v331_v51  ;;  %v341_v58 = vand.u32 2147483647, %v331_v51 }
 0x76e   :  { %v344_v60 = vor.u32 1.1754944e-38, %v343_v57  ;;  %vm342_vm1 = vcmp.eq.f32.partialorder %v341_v58, 8.507059e+37 }
 0x772   :  { %v1486_v52 = vpop.eup %1485 }
 0x773   :  { %v333_v53 = vmul.f32 %v1486_v52, %v331_v51  ;;  %vm338_vm13 = vweird.f32 %v1486_v52 }
 0x774   :  { %vm339_vm15 = vmor %vm337_vm14, %vm338_vm13 }
 0x775   :  { %v334_v54 = vsub.f32 1.0, %v333_v53 }
 0x777   :  { %v335_v55 = vmul.f32 %v1486_v52, %v334_v54 }
 0x779   :  { %v336_v56 = vadd.f32 %v1486_v52, %v335_v55 }
 0x77b   :  { %v340_v59 = vsel %vm339_vm15, %v1486_v52, %v336_v56 }
 0x77c   :  { %v345_v62 = vsel %vm342_vm1, %v344_v60, %v340_v59 }
 0x77d   :  { %v348_v0 = vmul.f32 %v345_v62, %v293_v30 }
 0x7da   :  { %v351_v61 = vpop.permute.xlu1 %350 }
 0x7db   :  { %v353_v63 = vmul.f32 %v351_v61, %v345_v62 }
 0x7dd   :  { %355 = vrot.lane.b32.xlu2 %v353_v63, %s1659_s1 }
 0x837   :  { %v356_v1 = vpop.permute.xlu2 %355 }
 0x838   :  { %v358_v2 = vadd.f32 %v356_v1, %v348_v0 }
 0x83a   :  { %1487 = vtanh.f32 %v358_v2 }
 0x840   :  { %v1488_v5 = vpop.eup %1487 }
 0x841   :  { %361 = vrot.lane.b32.xlu1 %v1488_v5, %s1658_s0 }
 0x8b3   :  { %v362_v6 = vpop.permute.xlu1 %361 }
 0x8b4   :  { %v364_v8 = vmul.f32 %v362_v6, %v345_v62 }
 0x8b6   :  { %366 = vrot.lane.b32.xlu2 %v364_v8, %s1659_s1 }
 0x910   :  { %v367_v9 = vpop.permute.xlu2 %366 }
 0x911   :  { %370 = vst.msk [vmem:[#allocation2 + $0x18] sm:$0xff] %vm110_vm0, %v367_v9  ;;  %1401 = vmatmul.msk.f32.vlgmr.msrb.gmra.mxu0 %vm110_vm0, %v367_v9  ;;  %v99_v9 = vpop.permute.xlu0 %98 }
 0x912   :  { %v101_v11 = vmul.f32 %v1715_v7, %v99_v9 }
 0x914   :  { %v102_v12 = vadd.f32 %v1718_v10, %v101_v11 }
 0x98e   :  { %v390_v14 = vpop.f32.mrf.mxu0 }
 0x98f   :  { %v391_v15 = vadd.f32 %v390_v14, %v90_v13 }
 0x991   :  { %1489 = vtanh.f32 %v391_v15  ;;  %v1402_v17 = vmul.f32 -1.442695, %v391_v15 }
 0x993   :  { %1491 = vpow2.f32 %v1402_v17 }
 0x997   :  { %v1490_v16 = vpop.eup %1489 }
 0x998   :  { %415 = vrot.lane.b32.xlu1 %v1490_v16, %s1658_s0 }
 0x999   :  { %v1492_v18 = vpop.eup %1491 }
 0x99a   :  { %v396_v19 = vadd.f32 1.0, %v1492_v18 }
 0x99c   :  { %1493 = vrcp.f32 %v396_v19  ;;  %v408_v25 = vand.u32 2147483648, %v396_v19  ;;  %vm402_vm3 = vweird.f32 %v396_v19  ;;  %v406_v26 = vand.u32 2147483647, %v396_v19 }
 0x99e   :  { %v409_v28 = vor.u32 1.1754944e-38, %v408_v25  ;;  %vm407_vm5 = vcmp.eq.f32.partialorder %v406_v26, 8.507059e+37 }
 0x9a2   :  { %v1494_v20 = vpop.eup %1493 }
 0x9a3   :  { %v398_v21 = vmul.f32 %v1494_v20, %v396_v19  ;;  %vm403_vm2 = vweird.f32 %v1494_v20 }
 0x9a4   :  { %vm404_vm4 = vmor %vm402_vm3, %vm403_vm2 }
 0x9a5   :  { %v399_v22 = vsub.f32 1.0, %v398_v21 }
 0x9a7   :  { %v400_v23 = vmul.f32 %v1494_v20, %v399_v22 }
 0x9a9   :  { %v401_v24 = vadd.f32 %v1494_v20, %v400_v23 }
 0x9ab   :  { %v405_v27 = vsel %vm404_vm4, %v1494_v20, %v401_v24 }
 0x9ac   :  { %v410_v30 = vsel %vm407_vm5, %v409_v28, %v405_v27 }
 0x9ad   :  { %v413_v32 = vmul.f32 %v410_v30, %v358_v2 }
 0xa0a   :  { %v416_v29 = vpop.permute.xlu1 %415 }
 0xa0b   :  { %v418_v31 = vmul.f32 %v416_v29, %v410_v30 }
 0xa0d   :  { %420 = vrot.lane.b32.xlu2 %v418_v31, %s1659_s1 }
 0xa67   :  { %v421_v33 = vpop.permute.xlu2 %420 }
 0xa68   :  { %v423_v34 = vadd.f32 %v421_v33, %v413_v32 }
 0xa6a   :  { %1495 = vtanh.f32 %v423_v34 }
 0xa70   :  { %v1496_v35 = vpop.eup %1495 }
 0xa71   :  { %426 = vrot.lane.b32.xlu1 %v1496_v35, %s1658_s0  ;;  %v632_v35 = vld [vmem:[#allocation2] sm:$0xff] }
 0xae3   :  { %v427_v36 = vpop.permute.xlu1 %426 }
 0xae4   :  { %v429_v37 = vmul.f32 %v427_v36, %v410_v30  ;;  %v641_v36 = vmul.f32 %v1750_v40, %v632_v35 }
 0xae6   :  { %431 = vrot.lane.b32.xlu2 %v429_v37, %s1659_s1  ;;  %v649_v37 = vsel %vm110_vm0, %v641_v36, 0.0 }
 0xb40   :  { %v432_v38 = vpop.permute.xlu2 %431 }
 0xb41   :  { %435 = vst.msk [vmem:[#allocation2 + $0x20] sm:$0xff] %vm110_vm0, %v432_v38  ;;  %1403 = vmatmul.msk.f32.vlgmr.msrb.gmra.mxu1 %vm110_vm0, %v432_v38 }
 0xb48   :  { %v636_v39 = vld [vmem:[#allocation2 + $0x20] sm:$0xff] }
 0xb49   :  { %v645_v41 = vmul.f32 %v1750_v40, %v636_v39 }
 0xb4b   :  { %v661_v42 = vsel %vm110_vm0, %v645_v41, 0.0 }
 0xb4c   :  { %662 = vadd.xlane.f32.xlu0 %v661_v42  ;;  %v105_v42 = vpop.permute.xlu0 %104 }
 0xb4d   :  { %v107_v43 = vmul.f32 %v1715_v7, %v105_v42 }
 0xb4f   :  { %v108_v44 = vadd.f32 %v1718_v10, %v107_v43 }
 0xbbe   :  { %v455_v46 = vpop.f32.mrf.mxu1 }
 0xbbf   :  { %v456_v47 = vadd.f32 %v455_v46, %v96_v45 }
 0xbc1   :  { %1497 = vtanh.f32 %v456_v47  ;;  %v1404_v48 = vmul.f32 -1.442695, %v456_v47 }
 0xbc3   :  { %1499 = vpow2.f32 %v1404_v48 }
 0xbc7   :  { %v1498_v4 = vpop.eup %1497 }
 0xbc8   :  { %480 = vrot.lane.b32.xlu1 %v1498_v4, %s1658_s0  ;;  %v633_v4 = vld [vmem:[#allocation2 + $0x8] sm:$0xff] }
 0xbc9   :  { %v1500_v49 = vpop.eup %1499  ;;  %v642_v48 = vmul.f32 %v1750_v40, %v633_v4 }
 0xbca   :  { %v461_v50 = vadd.f32 1.0, %v1500_v49 }
 0xbcb   :  { %v652_v49 = vsel %vm110_vm0, %v642_v48, 0.0 }
 0xbcc   :  { %1501 = vrcp.f32 %v461_v50  ;;  %v473_v56 = vand.u32 2147483648, %v461_v50  ;;  %vm467_vm7 = vweird.f32 %v461_v50  ;;  %v471_v57 = vand.u32 2147483647, %v461_v50 }
 0xbce   :  { %v474_v59 = vor.u32 1.1754944e-38, %v473_v56  ;;  %vm472_vm9 = vcmp.eq.f32.partialorder %v471_v57, 8.507059e+37  ;;  %v1800_v57 = vstv %s1409_s6 }
 0xbd2   :  { %v1502_v51 = vpop.eup %1501 }
 0xbd3   :  { %v463_v52 = vmul.f32 %v1502_v51, %v461_v50  ;;  %vm468_vm6 = vweird.f32 %v1502_v51  ;;  %v635_v50 = vld [vmem:[#allocation2 + $0x18] sm:$0xff] }
 0xbd4   :  { %vm469_vm8 = vmor %vm467_vm7, %vm468_vm6  ;;  %vm1123_vm7 = vcmask 1040384  }
 0xbd5   :  { %v464_v53 = vsub.f32 1.0, %v463_v52 }
 0xbd7   :  { %v465_v54 = vmul.f32 %v1502_v51, %v464_v53 }
 0xbd9   :  { %v466_v55 = vadd.f32 %v1502_v51, %v465_v54 }
 0xbdb   :  { %v470_v58 = vsel %vm469_vm8, %v1502_v51, %v466_v55  ;;  %v644_v51 = vmul.f32 %v1750_v40, %v635_v50 }
 0xbdc   :  { %v475_v61 = vsel %vm472_vm9, %v474_v59, %v470_v58 }
 0xbdd   :  { %v478_v63 = vmul.f32 %v475_v61, %v423_v34  ;;  %v658_v7 = vsel %vm110_vm0, %v644_v51, 0.0 }
 0xc3a   :  { %v481_v60 = vpop.permute.xlu1 %480 }
 0xc3b   :  { %v483_v62 = vmul.f32 %v481_v60, %v475_v61 }
 0xc3d   :  { %485 = vrot.lane.b32.xlu2 %v483_v62, %s1659_s1 }
 0xc97   :  { %v486_v0 = vpop.permute.xlu2 %485 }
 0xc98   :  { %v488_v1 = vadd.f32 %v486_v0, %v478_v63 }
 0xc9a   :  { %1503 = vtanh.f32 %v488_v1 }
 0xca0   :  { %v1504_v2 = vpop.eup %1503 }
 0xca1   :  { %491 = vrot.lane.b32.xlu1 %v1504_v2, %s1658_s0 }
 0xd13   :  { %v492_v5 = vpop.permute.xlu1 %491 }
 0xd14   :  { %v494_v6 = vmul.f32 %v492_v5, %v475_v61 }
 0xd16   :  { %496 = vrot.lane.b32.xlu2 %v494_v6, %s1659_s1 }
 0xd70   :  { %v497_v8 = vpop.permute.xlu2 %496 }
 0xd71   :  { %500 = vst.msk [vmem:[#allocation2 + $0x28] sm:$0xff] %vm110_vm0, %v497_v8  ;;  %1405 = vmatmul.msk.f32.vlgmr.msrb.gmra.mxu2 %vm110_vm0, %v497_v8 }
 0xdf4   :  { %v520_v13 = vpop.f32.mrf.mxu2 }
 0xdf5   :  { %v521_v14 = vadd.f32 %v520_v13, %v102_v12  ;;  %v855_v13 = vlaneseq }
 0xdf7   :  { %1505 = vtanh.f32 %v521_v14  ;;  %v1406_v16 = vmul.f32 -1.442695, %v521_v14  ;;  %v856_v14 = vshrl.u32 %v855_v13, 7 }
 0xdf9   :  { %1507 = vpow2.f32 %v1406_v16  ;;  %1448 = vset.pattern.permute.xlu1 %v856_v14  ;;  %1449 = vset.pattern.permute.xlu2 %v856_v14 }
 0xdfa   :  { %1450 = vset.pattern.permute.xlu0 %v856_v14 }
 0xdfd   :  { %v1506_v15 = vpop.eup %1505 }
 0xdfe   :  { %545 = vrot.lane.b32.xlu1 %v1506_v15, %s1658_s0 }
 0xdff   :  { %v1508_v17 = vpop.eup %1507 }
 0xe00   :  { %v526_v18 = vadd.f32 1.0, %v1508_v17 }
 0xe02   :  { %1509 = vrcp.f32 %v526_v18  ;;  %v538_v24 = vand.u32 2147483648, %v526_v18  ;;  %vm532_vm11 = vweird.f32 %v526_v18  ;;  %v536_v25 = vand.u32 2147483647, %v526_v18 }
 0xe04   :  { %v539_v27 = vor.u32 1.1754944e-38, %v538_v24  ;;  %vm537_vm13 = vcmp.eq.f32.partialorder %v536_v25, 8.507059e+37  ;;  %v637_v25 = vld [vmem:[#allocation2 + $0x28] sm:$0xff] }
 0xe08   :  { %v1510_v19 = vpop.eup %1509 }
 0xe09   :  { %v528_v20 = vmul.f32 %v1510_v19, %v526_v18  ;;  %vm533_vm10 = vweird.f32 %v1510_v19 }
 0xe0a   :  { %vm534_vm12 = vmor %vm532_vm11, %vm533_vm10 }
 0xe0b   :  { %v529_v21 = vsub.f32 1.0, %v528_v20 }
 0xe0d   :  { %v530_v22 = vmul.f32 %v1510_v19, %v529_v21 }
 0xe0f   :  { %v531_v23 = vadd.f32 %v1510_v19, %v530_v22 }
 0xe11   :  { %v535_v26 = vsel %vm534_vm12, %v1510_v19, %v531_v23 }
 0xe12   :  { %v540_v29 = vsel %vm537_vm13, %v539_v27, %v535_v26  ;;  %v1814_v26 = vand.u32 127, %v855_v13 }
 0xe13   :  { %v543_v31 = vmul.f32 %v540_v29, %v488_v1 }
 0xe70   :  { %v546_v28 = vpop.permute.xlu1 %545 }
 0xe71   :  { %v548_v30 = vmul.f32 %v546_v28, %v540_v29  ;;  %v646_v28 = vmul.f32 %v1750_v40, %v637_v25 }
 0xe73   :  { %550 = vrot.lane.b32.xlu2 %v548_v30, %s1659_s1  ;;  %v1028_v30 = vstv %s1811_s8  ;;  %v664_v35 = vsel %vm110_vm0, %v646_v28, 0.0 }
 0xecd   :  { %v551_v32 = vpop.permute.xlu2 %550 }
 0xece   :  { %v1784_v33 = vadd.f32 %v551_v32, %v543_v31 }
 0xed0   :  { %1511 = vtanh.f32 %v1784_v33 }
 0xed6   :  { %v1512_v34 = vpop.eup %1511 }
 0xed7   :  { %556 = vrot.lane.b32.xlu1 %v1512_v34, %s1658_s0 }
 0xf01   :  { %650 = vadd.xlane.f32.xlu1 %v649_v37  ;;  %v1007_v37 = vstv %s1816_s9 }
 0xf49   :  { %v557_v38 = vpop.permute.xlu1 %556 }
 0xf4a   :  { %v559_v39 = vmul.f32 %v557_v38, %v540_v29  ;;  %v1026_v29 = vstv %s1807_s7  ;;  %v1012_v38 = vstv %s1818_s10 }
 0xf4b   :  { %v1126_v34 = vsel %vm1123_vm7, %v1026_v29, %v1028_v30 }
 0xf4c   :  { %561 = vrot.lane.b32.xlu2 %v559_v39, %s1659_s1  ;;  %v1018_v39 = vstv %s1823_s11 }
 0xf74   :  { %v651_v55 = vpop.xlane.xlu1 %650 }
 0xf75   :  { %v674_v58 = vadd.f32 %v1800_v57, %v651_v55  ;;  %v657_v55 = vpop.xlane.xlu0 %656 }
 0xf77   :  { %v1410_v60 = vmul.f32 -1.442695, %v674_v58  ;;  %v676_v58 = vadd.f32 %v1800_v57, %v657_v55 }
 0xfa6   :  { %v562_v41 = vpop.permute.xlu2 %561 }
 0xfa7   :  { %565 = vst.msk [vmem:[#allocation2 + $0x30] sm:$0xff] %vm110_vm0, %v562_v41  ;;  %1407 = vmatmul.msk.f32.vlgmr.msrb.gmra.mxu3 %vm110_vm0, %v562_v41  ;;  %v1022_v41 = vstv %s1826_s12 }
0x102a   :  { %v585_v45 = vpop.f32.mrf.mxu3 }
0x102b   :  { %v586_v46 = vadd.f32 %v585_v45, %v108_v44  ;;  %v1852_v44 = vsel %vm1123_vm7, %v1007_v37, %v1012_v38  ;;  %v1859_v45 = vsel %vm1123_vm7, %v1018_v39, %v1022_v41 }
0x102d   :  { %1513 = vtanh.f32 %v586_v46  ;;  %v1408_v52 = vmul.f32 -1.442695, %v586_v46 }
0x102f   :  { %1515 = vpow2.f32 %v1408_v52 }
0x1033   :  { %v1514_v47 = vpop.eup %1513 }
0x1034   :  { %610 = vrot.lane.b32.xlu2 %v1514_v47, %s1658_s0 }
0x1035   :  { %v1516_v10 = vpop.eup %1515 }
0x1036   :  { %v591_v53 = vadd.f32 1.0, %v1516_v10 }
0x1038   :  { %1517 = vrcp.f32 %v591_v53  ;;  %v603_v63 = vand.u32 2147483648, %v591_v53  ;;  %vm597_vm15 = vweird.f32 %v591_v53  ;;  %v601_v0 = vand.u32 2147483647, %v591_v53 }
0x1039   :  { %1519 = vpow2.f32 %v1410_v60 }
0x103a   :  { %v604_v5 = vor.u32 1.1754944e-38, %v603_v63  ;;  %vm602_vm2 = vcmp.eq.f32.partialorder %v601_v0, 8.507059e+37 }
0x103e   :  { %v1518_v54 = vpop.eup %1517 }
0x103f   :  { %v593_v56 = vmul.f32 %v1518_v54, %v591_v53  ;;  %vm598_vm14 = vweird.f32 %v1518_v54  ;;  %v1520_v1 = vpop.eup %1519 }
0x1040   :  { %vm599_vm1 = vmor %vm597_vm15, %vm598_vm14  ;;  %v706_v6 = vadd.f32 1.0, %v1520_v1 }
0x1041   :  { %v594_v59 = vsub.f32 1.0, %v593_v56 }
0x1042   :  { %1521 = vrcp.f32 %v706_v6  ;;  %v725_v19 = vand.u32 2147483648, %v706_v6  ;;  %vm719_vm4 = vweird.f32 %v706_v6  ;;  %v723_v20 = vand.u32 2147483647, %v706_v6 }
0x1043   :  { %v595_v61 = vmul.f32 %v1518_v54, %v594_v59 }
0x1044   :  { %v726_v22 = vor.u32 1.1754944e-38, %v725_v19  ;;  %vm724_vm6 = vcmp.eq.f32.partialorder %v723_v20, 8.507059e+37 }
0x1045   :  { %v596_v62 = vadd.f32 %v1518_v54, %v595_v61 }
0x1047   :  { %v600_v2 = vsel %vm599_vm1, %v1518_v54, %v596_v62  ;;  %v1412_v62 = vmul.f32 -1.442695, %v676_v58 }
0x1048   :  { %v1803_v9 = vsel %vm602_vm2, %v604_v5, %v600_v2  ;;  %v1522_v12 = vpop.eup %1521  ;;  %v1879_v2 = vld [vmem:[%s2090_s2 + $0x8] sm:$0xff] }
0x1049   :  { %v715_v15 = vmul.f32 %v1522_v12, %v706_v6  ;;  %vm720_vm3 = vweird.f32 %v1522_v12  ;;  %vm1163_vm8 = vcmp.gt.f32.partialorder %v1879_v2, 0.0 }
0x104a   :  { %vm721_vm5 = vmor %vm719_vm4, %vm720_vm3 }
0x104b   :  { %v716_v16 = vsub.f32 1.0, %v715_v15 }
0x104d   :  { %v717_v17 = vmul.f32 %v1522_v12, %v716_v16 }
0x104f   :  { %v718_v18 = vadd.f32 %v1522_v12, %v717_v17 }
0x1051   :  { %v722_v21 = vsel %vm721_vm5, %v1522_v12, %v718_v18 }
0x1052   :  { %v1809_v23 = vsel %vm724_vm6, %v726_v22, %v722_v21  ;;  %v1884_v22 = vsel %vm1163_vm8, 1, %v1657_v3 }
0x1053   :  { %v834_v24 = vsub.f32 1.0, %v1809_v23  ;;  %v1132_v31 = vperm.slane %v1809_v23, %v1814_v26 }
0x1055   :  { %v1129_v27 = vperm.slane %v834_v24, %v1814_v26 }
0x1057   :  { %v1134_v32 = vsel %vm1123_vm7, %v1129_v27, %v1132_v31 }
0x1058   :  { %v1839_v36 = vadd.f32 %v1134_v32, %v1126_v34 }
0x105a   :  { %v1136_v42 = vperm.slane %v1839_v36, 0  ;;  %v1138_v43 = vperm.slane %v1839_v36, 1 }
0x105c   :  { %v1137_v46 = vadd.f32 %v1136_v42, %v1852_v44  ;;  %v1139_v47 = vadd.f32 %v1138_v43, %v1859_v45 }
0x105d   :  { %653 = vadd.xlane.f32.xlu2 %v652_v49  ;;  %v1866_v49 = vld [vmem:[%s2090_s2] sm:$0xff] }
0x105e   :  { %v1140_v4 = vmax.f32 %v1137_v46, %v1139_v47  ;;  %v1141_v48 = vmin.f32 %v1137_v46, %v1139_v47  ;;  %v1869_v50 = vsub.f32 1.0, %v1866_v49  ;;  %v941_v56 = vperm.slane %v1866_v49, 2 }
0x1060   :  { %v1142_v51 = vsub.f32 %v1141_v48, %v1140_v4  ;;  %v875_v0 = vperm.slane %v1869_v50, 3  ;;  %v882_v13 = vperm.slane %v1869_v50, 4  ;;  %v889_v42 = vperm.slane %v1869_v50, 5 }
0x1062   :  { %v1143_v10 = vmul.f32 1.442695, %v1142_v51 }
0x1064   :  { %1523 = vpow2.f32 %v1143_v10 }
0x1065   :  { %659 = vadd.xlane.f32.xlu2 %v658_v7  ;;  %v861_v7 = vperm.slane %v1869_v50, 1 }
0x106a   :  { %v1524_v59 = vpop.eup %1523 }
0x106b   :  { %v1145_v63 = vadd.f32 1.0, %v1524_v59  ;;  %v1148_v6 = vmul.f32 -0.5, %v1524_v59  ;;  %v1151_v19 = vand.u32 2147483647, %v1524_v59 }
0x106d   :  { %v1149_v17 = vadd.f32 1.0, %v1148_v6  ;;  %vm1152_vm13 = vcmp.lt.f32.partialorder %v1151_v19, 0.0004427343 }
0x106f   :  { %v1150_v28 = vmul.f32 %v1524_v59, %v1149_v17 }
0x108e   :  { %v611_v8 = vpop.permute.xlu2 %610 }
0x108f   :  { %v613_v11 = vmul.f32 %v611_v8, %v1803_v9 }
0x1091   :  { %615 = vrot.lane.b32.xlu1 %v613_v11, %s1659_s1 }
0x10bb   :  { %665 = vadd.xlane.f32.xlu1 %v664_v35  ;;  %v1165_v35 = vperm.slane %v1884_v22, 1 }
0x10bd   :  { %vm1166_vm14 = vcmp.eq.s32.totalorder %v1165_v35, 1 }
0x10d0   :  { %v654_v52 = vpop.xlane.xlu2 %653 }
0x10d1   :  { %v675_v53 = vadd.f32 %v1800_v57, %v654_v52 }
0x10d3   :  { %v1411_v54 = vmul.f32 -1.442695, %v675_v53 }
0x10d4   :  { %866 = vperm.xlu1 %1448, %v861_v7  }
0x10d5   :  { %1525 = vpow2.f32 %v1411_v54 }
0x10d8   :  { %v660_v55 = vpop.xlane.xlu2 %659 }
0x10d9   :  { %v677_v59 = vadd.f32 %v1800_v57, %v660_v55 }
0x10db   :  { %v1526_v60 = vpop.eup %1525 }
0x10dc   :  { %v707_v61 = vadd.f32 1.0, %v1526_v60  ;;  %946 = vperm.xlu1 %1448, %v941_v56  }
0x10de   :  { %1527 = vrcp.f32 %v707_v61  ;;  %v740_v14 = vand.u32 2147483648, %v707_v61  ;;  %v738_v16 = vand.u32 2147483647, %v707_v61  ;;  %vm734_vm10 = vweird.f32 %v707_v61 }
0x10df   :  { %1529 = vpow2.f32 %v1412_v62 }
0x10e0   :  { %1531 = vlog2.f32 %v1145_v63  ;;  %v741_v25 = vor.u32 1.1754944e-38, %v740_v14  ;;  %vm739_vm12 = vcmp.eq.f32.partialorder %v738_v16, 8.507059e+37  ;;  %v1413_v63 = vmul.f32 -1.442695, %v677_v59 }
0x10e4   :  { %v1528_v1 = vpop.eup %1527  ;;  %880 = vperm.xlu1 %1448, %v875_v0  }
0x10e5   :  { %v730_v5 = vmul.f32 %v1528_v1, %v707_v61  ;;  %v1530_v8 = vpop.eup %1529  ;;  %vm735_vm9 = vweird.f32 %v1528_v1 }
0x10e6   :  { %v1532_v12 = vpop.eup %1531  ;;  %v708_v18 = vadd.f32 1.0, %v1530_v8  ;;  %vm736_vm11 = vmor %vm734_vm10, %vm735_vm9 }
0x10e7   :  { %v731_v11 = vsub.f32 1.0, %v730_v5  ;;  %v1147_v21 = vmul.f32 0.6931472, %v1532_v12 }
0x10e8   :  { %1533 = vrcp.f32 %v708_v18  ;;  %vm749_vm1 = vweird.f32 %v708_v18  ;;  %v753_v12 = vand.u32 2147483647, %v708_v18 }
0x10e9   :  { %v732_v15 = vmul.f32 %v1528_v1, %v731_v11  ;;  %v1153_v34 = vsel %vm1152_vm13, %v1150_v28, %v1147_v21  ;;  %v755_v11 = vand.u32 2147483648, %v708_v18 }
0x10ea   :  { %v1154_v47 = vadd.f32 %v1153_v34, %v1140_v4  ;;  %vm754_vm3 = vcmp.eq.f32.partialorder %v753_v12, 8.507059e+37 }
0x10eb   :  { %v733_v20 = vadd.f32 %v1528_v1, %v732_v15  ;;  %v756_v15 = vor.u32 1.1754944e-38, %v755_v11 }
0x10ec   :  { %887 = vperm.xlu1 %1448, %v882_v13  }
0x10ed   :  { %v737_v27 = vsel %vm736_vm11, %v1528_v1, %v733_v20 }
0x10ee   :  { %v1886_v31 = vsel %vm739_vm12, %v741_v25, %v737_v27  ;;  %v1534_v51 = vpop.eup %1533 }
0x10ef   :  { %v835_v32 = vsub.f32 1.0, %v1886_v31  ;;  %v1159_v46 = vperm.slane %v1886_v31, %v1814_v26  ;;  %v745_v10 = vmul.f32 %v1534_v51, %v708_v18  ;;  %vm750_vm15 = vweird.f32 %v1534_v51 }
0x10f0   :  { %vm751_vm2 = vmor %vm749_vm1, %vm750_vm15 }
0x10f1   :  { %v1156_v43 = vperm.slane %v835_v32, %v1814_v26  ;;  %v746_v60 = vsub.f32 1.0, %v745_v10 }
0x10f3   :  { %v1161_v48 = vsel %vm1123_vm7, %v1156_v43, %v1159_v46  ;;  %v747_v0 = vmul.f32 %v1534_v51, %v746_v60  ;;  %v1195_v43 = vperm.slane %v1884_v22, 2 }
0x10f4   :  { %894 = vperm.xlu1 %1448, %v889_v42   ;;  %v1162_v52 = vadd.f32 %v1161_v48, %v1154_v47 }
0x10f5   :  { %v748_v6 = vadd.f32 %v1534_v51, %v747_v0  ;;  %vm1196_vm5 = vcmp.eq.s32.totalorder %v1195_v43, 1 }
0x10f6   :  { %v1167_v7 = vsel %vm1166_vm14, %v1162_v52, %v1839_v36  ;;  %v608_v36 = vmul.f32 %v1803_v9, %v1784_v33 }
0x10f7   :  { %v1168_v53 = vperm.slane %v1167_v7, 0  ;;  %v1170_v54 = vperm.slane %v1167_v7, 1  ;;  %v752_v14 = vsel %vm751_vm2, %v1534_v51, %v748_v6 }
0x10f8   :  { %v1903_v20 = vsel %vm754_vm3, %v756_v15, %v752_v14 }
0x10f9   :  { %v1169_v56 = vadd.f32 %v1168_v53, %v1852_v44  ;;  %v1171_v58 = vadd.f32 %v1170_v54, %v1859_v45  ;;  %v836_v25 = vsub.f32 1.0, %v1903_v20  ;;  %v1191_v46 = vperm.slane %v1903_v20, %v1814_v26 }
0x10fb   :  { %v1172_v4 = vmax.f32 %v1169_v56, %v1171_v58  ;;  %v1173_v61 = vmin.f32 %v1169_v56, %v1171_v58  ;;  %v1188_v34 = vperm.slane %v836_v25, %v1814_v26  ;;  %v663_v58 = vpop.xlane.xlu0 %662 }
0x10fd   :  { %v1174_v62 = vsub.f32 %v1173_v61, %v1172_v4  ;;  %v1193_v51 = vsel %vm1123_vm7, %v1188_v34, %v1191_v46  ;;  %v678_v61 = vadd.f32 %v1800_v57, %v663_v58  ;;  %v1225_v46 = vperm.slane %v1884_v22, 3 }
0x10ff   :  { %v1175_v1 = vmul.f32 1.442695, %v1174_v62  ;;  %vm1226_vm12 = vcmp.eq.s32.totalorder %v1225_v46, 1 }
0x1101   :  { %1535 = vpow2.f32 %v1175_v1  ;;  %v1414_v1 = vmul.f32 -1.442695, %v678_v61 }
0x1102   :  { %1537 = vpow2.f32 %v1413_v63 }
0x1103   :  { %v616_v5 = vpop.permute.xlu1 %615 }
0x1104   :  { %v618_v8 = vadd.f32 %v616_v5, %v608_v36 }
0x1106   :  { %1539 = vtanh.f32 %v618_v8 }
0x1107   :  { %v1536_v13 = vpop.eup %1535 }
0x1108   :  { %v1177_v16 = vadd.f32 1.0, %v1536_v13  ;;  %v1538_v17 = vpop.eup %1537  ;;  %v1180_v19 = vmul.f32 -0.5, %v1536_v13  ;;  %v1183_v18 = vand.u32 2147483647, %v1536_v13 }
0x1109   :  { %v709_v21 = vadd.f32 1.0, %v1538_v17 }
0x110a   :  { %1541 = vlog2.f32 %v1177_v16  ;;  %v1181_v27 = vadd.f32 1.0, %v1180_v19  ;;  %vm1184_vm4 = vcmp.lt.f32.partialorder %v1183_v18, 0.0004427343 }
0x110b   :  { %1543 = vrcp.f32 %v709_v21  ;;  %v770_v6 = vand.u32 2147483648, %v709_v21  ;;  %vm764_vm8 = vweird.f32 %v709_v21  ;;  %v768_v8 = vand.u32 2147483647, %v709_v21 }
0x110c   :  { %v1540_v33 = vpop.eup %1539  ;;  %v1182_v42 = vmul.f32 %v1536_v13, %v1181_v27 }
0x110d   :  { %621 = vrot.lane.b32.xlu2 %v1540_v33, %s1658_s0  ;;  %v771_v13 = vor.u32 1.1754944e-38, %v770_v6  ;;  %vm769_vm10 = vcmp.eq.f32.partialorder %v768_v8, 8.507059e+37  ;;  %v638_v33 = vld [vmem:[#allocation2 + $0x30] sm:$0xff] }
0x110e   :  { %v647_v34 = vmul.f32 %v1750_v40, %v638_v33 }
0x1110   :  { %v1542_v28 = vpop.eup %1541 }
0x1111   :  { %v1179_v35 = vmul.f32 0.6931472, %v1542_v28  ;;  %v1544_v52 = vpop.eup %1543 }
0x1112   :  { %v760_v54 = vmul.f32 %v1544_v52, %v709_v21  ;;  %vm765_vm6 = vweird.f32 %v1544_v52 }
0x1113   :  { %v1185_v47 = vsel %vm1184_vm4, %v1182_v42, %v1179_v35  ;;  %vm766_vm9 = vmor %vm764_vm8, %vm765_vm6 }
0x1114   :  { %v1186_v48 = vadd.f32 %v1185_v47, %v1172_v4  ;;  %v761_v62 = vsub.f32 1.0, %v760_v54  ;;  %v667_v47 = vsel %vm110_vm0, %v647_v34, 0.0 }
0x1116   :  { %v1194_v10 = vadd.f32 %v1193_v51, %v1186_v48  ;;  %v762_v36 = vmul.f32 %v1544_v52, %v761_v62  ;;  %v896_v51 = vperm.slane %v1869_v50, 6 }
0x1118   :  { %v1197_v53 = vsel %vm1196_vm5, %v1194_v10, %v1167_v7  ;;  %v763_v7 = vadd.f32 %v1544_v52, %v762_v36  ;;  %901 = vperm.xlu1 %1448, %v896_v51  }
0x1119   :  { %v1198_v55 = vperm.slane %v1197_v53, 0  ;;  %v1200_v56 = vperm.slane %v1197_v53, 1 }
0x111a   :  { %v767_v12 = vsel %vm766_vm9, %v1544_v52, %v763_v7 }
0x111b   :  { %v1199_v59 = vadd.f32 %v1198_v55, %v1852_v44  ;;  %v1201_v60 = vadd.f32 %v1200_v56, %v1859_v45  ;;  %v1917_v17 = vsel %vm769_vm10, %v771_v13, %v767_v12  ;;  %v868_v13 = vperm.slane %v1869_v50, 2 }
0x111c   :  { %v837_v27 = vsub.f32 1.0, %v1917_v17  ;;  %v1221_v48 = vperm.slane %v1917_v17, %v1814_v26 }
0x111d   :  { %v1202_v63 = vmax.f32 %v1199_v59, %v1201_v60  ;;  %v1203_v0 = vmin.f32 %v1199_v59, %v1201_v60 }
0x111e   :  { %v1218_v35 = vperm.slane %v837_v27, %v1814_v26 }
0x111f   :  { %v1204_v4 = vsub.f32 %v1203_v0, %v1202_v63 }
0x1120   :  { %v1223_v10 = vsel %vm1123_vm7, %v1218_v35, %v1221_v48 }
0x1121   :  { %v1205_v5 = vmul.f32 1.442695, %v1204_v4 }
0x1123   :  { %1545 = vpow2.f32 %v1205_v5 }
0x1124   :  { %1547 = vpow2.f32 %v1414_v1 }
0x1129   :  { %v1546_v11 = vpop.eup %1545 }
0x112a   :  { %v1207_v14 = vadd.f32 1.0, %v1546_v11  ;;  %v1548_v15 = vpop.eup %1547  ;;  %v1210_v16 = vmul.f32 -0.5, %v1546_v11  ;;  %v1213_v28 = vand.u32 2147483647, %v1546_v11 }
0x112b   :  { %v710_v19 = vadd.f32 1.0, %v1548_v15 }
0x112c   :  { %1549 = vlog2.f32 %v1207_v14  ;;  %v1211_v18 = vadd.f32 1.0, %v1210_v16  ;;  %vm1214_vm11 = vcmp.lt.f32.partialorder %v1213_v28, 0.0004427343 }
0x112d   :  { %1551 = vrcp.f32 %v710_v19  ;;  %vm779_vm14 = vweird.f32 %v710_v19  ;;  %v783_v12 = vand.u32 2147483647, %v710_v19 }
0x112e   :  { %v1212_v43 = vmul.f32 %v1546_v11, %v1211_v18  ;;  %v666_v61 = vpop.xlane.xlu1 %665  ;;  %v785_v11 = vand.u32 2147483648, %v710_v19 }
0x112f   :  { %v679_v4 = vadd.f32 %v1800_v57, %v666_v61  ;;  %vm784_vm1 = vcmp.eq.f32.partialorder %v783_v12, 8.507059e+37 }
0x1130   :  { %v786_v16 = vor.u32 1.1754944e-38, %v785_v11 }
0x1131   :  { %v1415_v7 = vmul.f32 -1.442695, %v679_v4 }
0x1132   :  { %v1550_v21 = vpop.eup %1549 }
0x1133   :  { %v1209_v42 = vmul.f32 0.6931472, %v1550_v21  ;;  %v1552_v54 = vpop.eup %1551 }
0x1134   :  { %v775_v58 = vmul.f32 %v1552_v54, %v710_v19  ;;  %vm780_vm13 = vweird.f32 %v1552_v54  ;;  %v948_v19 = vperm.slane %v1866_v49, 3 }
0x1135   :  { %v1215_v52 = vsel %vm1214_vm11, %v1212_v43, %v1209_v42  ;;  %vm781_vm15 = vmor %vm779_vm14, %vm780_vm13 }
0x1136   :  { %668 = vadd.xlane.f32.xlu2 %v667_v47  ;;  %v1216_v40 = vadd.f32 %v1215_v52, %v1202_v63  ;;  %v776_v1 = vsub.f32 1.0, %v775_v58  ;;  %v1255_v52 = vperm.slane %v1884_v22, 4 }
0x1138   :  { %v1224_v55 = vadd.f32 %v1223_v10, %v1216_v40  ;;  %v777_v6 = vmul.f32 %v1552_v54, %v776_v1  ;;  %vm1256_vm3 = vcmp.eq.s32.totalorder %v1255_v52, 1 }
0x113a   :  { %v1227_v56 = vsel %vm1226_vm12, %v1224_v55, %v1197_v53  ;;  %v778_v53 = vadd.f32 %v1552_v54, %v777_v6 }
0x113b   :  { %v1228_v59 = vperm.slane %v1227_v56, 0  ;;  %v1230_v60 = vperm.slane %v1227_v56, 1 }
0x113c   :  { %v782_v15 = vsel %vm781_vm15, %v1552_v54, %v778_v53 }
0x113d   :  { %v1229_v62 = vadd.f32 %v1228_v59, %v1852_v44  ;;  %v1231_v0 = vadd.f32 %v1230_v60, %v1859_v45  ;;  %v1934_v34 = vsel %vm784_vm1, %v786_v16, %v782_v15  ;;  %v955_v59 = vperm.slane %v1866_v49, 4 }
0x113e   :  { %v838_v35 = vsub.f32 1.0, %v1934_v34  ;;  %v1251_v40 = vperm.slane %v1934_v34, %v1814_v26  ;;  %v903_v15 = vperm.slane %v1869_v50, 7 }
0x113f   :  { %v1232_v36 = vmax.f32 %v1229_v62, %v1231_v0  ;;  %v1233_v63 = vmin.f32 %v1229_v62, %v1231_v0 }
0x1140   :  { %v1248_v47 = vperm.slane %v838_v35, %v1814_v26 }
0x1141   :  { %v1234_v5 = vsub.f32 %v1233_v63, %v1232_v36 }
0x1142   :  { %v1253_v55 = vsel %vm1123_vm7, %v1248_v47, %v1251_v40 }
0x1143   :  { %v1235_v8 = vmul.f32 1.442695, %v1234_v5 }
0x1145   :  { %1553 = vpow2.f32 %v1235_v8 }
0x1146   :  { %1555 = vpow2.f32 %v1415_v7 }
0x114b   :  { %v1554_v14 = vpop.eup %1553 }
0x114c   :  { %v1237_v33 = vadd.f32 1.0, %v1554_v14  ;;  %v1556_v18 = vpop.eup %1555  ;;  %v1240_v28 = vmul.f32 -0.5, %v1554_v14  ;;  %v1243_v43 = vand.u32 2147483647, %v1554_v14 }
0x114d   :  { %v711_v21 = vadd.f32 1.0, %v1556_v18 }
0x114e   :  { %873 = vperm.xlu2 %1449, %v868_v13   ;;  %1557 = vlog2.f32 %v1237_v33  ;;  %v1241_v42 = vadd.f32 1.0, %v1240_v28  ;;  %vm1244_vm2 = vcmp.lt.f32.partialorder %v1243_v43, 0.0004427343 }
0x114f   :  { %1559 = vrcp.f32 %v711_v21  ;;  %vm794_vm5 = vweird.f32 %v711_v21  ;;  %v798_v16 = vand.u32 2147483647, %v711_v21 }
0x1150   :  { %v1242_v51 = vmul.f32 %v1554_v14, %v1241_v42  ;;  %v800_v14 = vand.u32 2147483648, %v711_v21  ;;  %v934_v42 = vperm.slane %v1866_v49, 1 }
0x1151   :  { %vm799_vm8 = vcmp.eq.f32.partialorder %v798_v16, 8.507059e+37 }
0x1152   :  { %v801_v28 = vor.u32 1.1754944e-38, %v800_v14  ;;  %v976_v14 = vperm.slane %v1866_v49, 7 }
0x1154   :  { %v1558_v46 = vpop.eup %1557  ;;  %981 = vperm.xlu1 %1448, %v976_v14  }
0x1155   :  { %v1239_v48 = vmul.f32 0.6931472, %v1558_v46  ;;  %v1560_v58 = vpop.eup %1559  ;;  %v927_v46 = vperm.slane %v1866_v49, 0 }
0x1156   :  { %953 = vperm.xlu2 %1449, %v948_v19   ;;  %v790_v62 = vmul.f32 %v1560_v58, %v711_v21  ;;  %vm795_vm4 = vweird.f32 %v1560_v58 }
0x1157   :  { %v1245_v10 = vsel %vm1244_vm2, %v1242_v51, %v1239_v48  ;;  %vm796_vm6 = vmor %vm794_vm5, %vm795_vm4 }
0x1158   :  { %v1246_v54 = vadd.f32 %v1245_v10, %v1232_v36  ;;  %v791_v5 = vsub.f32 1.0, %v790_v62  ;;  %v962_v36 = vperm.slane %v1866_v49, 5 }
0x115a   :  { %v1254_v60 = vadd.f32 %v1253_v55, %v1246_v54  ;;  %v792_v53 = vmul.f32 %v1560_v58, %v791_v5  ;;  %v1285_v54 = vperm.slane %v1884_v22, 5 }
0x115c   :  { %v1257_v61 = vsel %vm1256_vm3, %v1254_v60, %v1227_v56  ;;  %v793_v13 = vadd.f32 %v1560_v58, %v792_v53  ;;  %vm1286_vm10 = vcmp.eq.s32.totalorder %v1285_v54, 1  ;;  %1451 = vset.pattern.permute.xlu1 %v1657_v3 }
0x115d   :  { %v1258_v0 = vperm.slane %v1257_v61, 0  ;;  %v1260_v4 = vperm.slane %v1257_v61, 1 }
0x115e   :  { %960 = vperm.xlu2 %1449, %v955_v59   ;;  %v797_v18 = vsel %vm796_vm6, %v1560_v58, %v793_v13 }
0x115f   :  { %v1259_v1 = vadd.f32 %v1258_v0, %v1852_v44  ;;  %v1261_v63 = vadd.f32 %v1260_v4, %v1859_v45 }
0x1161   :  { %v1262_v7 = vmax.f32 %v1259_v1, %v1261_v63  ;;  %v1263_v6 = vmin.f32 %v1259_v1, %v1261_v63 }
0x1163   :  { %v1264_v8 = vsub.f32 %v1263_v6, %v1262_v7  ;;  %v1971_v6 = vpop.permute.xlu1 %866 }
0x1165   :  { %v1265_v11 = vmul.f32 1.442695, %v1264_v8 }
0x1166   :  { %967 = vperm.xlu2 %1449, %v962_v36  }
0x1167   :  { %v622_v12 = vpop.permute.xlu2 %621  ;;  %1561 = vpow2.f32 %v1265_v11 }
0x1168   :  { %v624_v56 = vmul.f32 %v622_v12, %v1803_v9  ;;  %v1953_v9 = vsel %vm799_vm8, %v801_v28, %v797_v18  ;;  %vm1086_vm8 = vcmask 63488  }
0x1169   :  { %v839_v47 = vsub.f32 1.0, %v1953_v9  ;;  %v1281_v55 = vperm.slane %v1953_v9, %v1814_v26 }
0x116a   :  { %626 = vrot.lane.b32.xlu0 %v624_v56, %s1659_s1 }
0x116b   :  { %v1278_v52 = vperm.slane %v839_v47, %v1814_v26  ;;  %v947_v53 = vpop.permute.xlu1 %946 }
0x116d   :  { %v1562_v33 = vpop.eup %1561  ;;  %v1283_v60 = vsel %vm1123_vm7, %v1278_v52, %v1281_v55 }
0x116e   :  { %908 = vperm.xlu2 %1449, %v903_v15   ;;  %v1267_v19 = vadd.f32 1.0, %v1562_v33  ;;  %v1270_v43 = vmul.f32 -0.5, %v1562_v33  ;;  %v1273_v21 = vand.u32 2147483647, %v1562_v33  ;;  %v993_v15 = vmul.f32 %v947_v53, %v1903_v20 }
0x1170   :  { %1563 = vlog2.f32 %v1267_v19  ;;  %v1271_v48 = vadd.f32 1.0, %v1270_v43  ;;  %vm1274_vm9 = vcmp.lt.f32.partialorder %v1273_v21, 0.0004427343 }
0x1172   :  { %939 = vperm.xlu0 %1450, %v934_v42   ;;  %v1272_v10 = vmul.f32 %v1562_v33, %v1271_v48 }
0x1173   :  { %v881_v18 = vpop.permute.xlu1 %880 }
0x1174   :  { %v921_v48 = vmul.f32 %v881_v18, %v837_v27 }
0x1176   :  { %v1564_v51 = vpop.eup %1563  ;;  %932 = vperm.xlu2 %1449, %v927_v46  }
0x1177   :  { %v1269_v40 = vmul.f32 0.6931472, %v1564_v51 }
0x1179   :  { %v1275_v58 = vsel %vm1274_vm9, %v1272_v10, %v1269_v40  ;;  %vm1070_vm9 = vcmask 1042434  }
0x117a   :  { %v1276_v59 = vadd.f32 %v1275_v58, %v1262_v7 }
0x117b   :  { %v888_v51 = vpop.permute.xlu1 %887 }
0x117c   :  { %v1284_v62 = vadd.f32 %v1283_v60, %v1276_v59 }
0x117e   :  { %1453 = vset.pattern.permute.xlu2 %v1657_v3  ;;  %v1965_v0 = vsel %vm1286_vm10, %v1284_v62, %v1257_v61  ;;  %vm1072_vm10 = vcmask 1043459  }
0x117f   :  { %v1288_v4 = vperm.slane %v1965_v0, 0  ;;  %v1290_v1 = vperm.slane %v1965_v0, 1 }
0x1181   :  { %v1289_v63 = vadd.f32 %v1288_v4, %v1852_v44  ;;  %v1291_v5 = vadd.f32 %v1290_v1, %v1859_v45 }
0x1183   :  { %v1292_v36 = vmax.f32 %v1289_v63, %v1291_v5  ;;  %v1293_v7 = vmin.f32 %v1289_v63, %v1291_v5 }
0x1185   :  { %v1294_v8 = vsub.f32 %v1293_v7, %v1292_v36  ;;  %v895_v7 = vpop.permute.xlu1 %894 }
0x1187   :  { %v1295_v12 = vmul.f32 1.442695, %v1294_v8 }
0x1189   :  { %1565 = vpow2.f32 %v1295_v12  ;;  %v1315_v12 = vperm.slane %v1884_v22, 6 }
0x118b   :  { %vm1316_vm1 = vcmp.eq.s32.totalorder %v1315_v12, 1 }
0x118f   :  { %v1566_v33 = vpop.eup %1565 }
0x1190   :  { %v1297_v43 = vadd.f32 1.0, %v1566_v33  ;;  %v1300_v40 = vmul.f32 -0.5, %v1566_v33  ;;  %v1303_v27 = vand.u32 2147483647, %v1566_v33 }
0x1192   :  { %v1301_v62 = vadd.f32 1.0, %v1300_v40  ;;  %vm1304_vm15 = vcmp.lt.f32.partialorder %v1303_v27, 0.0004427343 }
0x1194   :  { %v1302_v5 = vmul.f32 %v1566_v33, %v1301_v62 }
0x11a9   :  { %v669_v11 = vpop.xlane.xlu2 %668 }
0x11aa   :  { %v680_v56 = vadd.f32 %v1800_v57, %v669_v11 }
0x11ac   :  { %v1416_v61 = vmul.f32 -1.442695, %v680_v56 }
0x11ae   :  { %1567 = vpow2.f32 %v1416_v61  ;;  %v923_v61 = vmul.f32 %v895_v7, %v839_v47 }
0x11b1   :  { %v874_v13 = vpop.permute.xlu2 %873 }
0x11b2   :  { %v920_v16 = vmul.f32 %v874_v13, %v836_v25 }
0x11b4   :  { %v1568_v28 = vpop.eup %1567  ;;  %v1978_v42 = vadd.f32 %v993_v15, %v920_v16 }
0x11b5   :  { %v712_v19 = vadd.f32 1.0, %v1568_v28 }
0x11b7   :  { %1569 = vrcp.f32 %v712_v19  ;;  %v815_v58 = vand.u32 2147483648, %v712_v19  ;;  %v813_v60 = vand.u32 2147483647, %v712_v19  ;;  %vm809_vm12 = vweird.f32 %v712_v19 }
0x11b8   :  { %1571 = vlog2.f32 %v1297_v43 }
0x11b9   :  { %v954_v46 = vpop.permute.xlu2 %953  ;;  %v816_v1 = vor.u32 1.1754944e-38, %v815_v58  ;;  %vm814_vm14 = vcmp.eq.f32.partialorder %v813_v60, 8.507059e+37 }
0x11ba   :  { %v994_v21 = vmul.f32 %v954_v46, %v1917_v17 }
0x11bc   :  { %v1002_v20 = vadd.f32 %v994_v21, %v921_v48  ;;  %v919_v48 = vmul.f32 %v1971_v6, %v835_v32  ;;  %v854_v32 = vperm.slane %v1869_v50, 0 }
0x11bd   :  { %v1570_v25 = vpop.eup %1569 }
0x11be   :  { %v805_v52 = vmul.f32 %v1570_v25, %v712_v19  ;;  %1045 = vperm.xlu2 %1453, %v1002_v20   ;;  %v1572_v54 = vpop.eup %1571  ;;  %vm810_vm11 = vweird.f32 %v1570_v25 }
0x11bf   :  { %v1299_v17 = vmul.f32 0.6931472, %v1572_v54  ;;  %vm811_vm13 = vmor %vm809_vm12, %vm810_vm11  ;;  %vm1074_vm11 = vcmask 1044484   ;;  %vm1076_vm12 = vcmask 1045509  }
0x11c0   :  { %v806_v10 = vsub.f32 1.0, %v805_v52  ;;  %v922_v52 = vmul.f32 %v888_v51, %v838_v35 }
0x11c1   :  { %v961_v55 = vpop.permute.xlu2 %960  ;;  %v1305_v11 = vsel %vm1304_vm15, %v1302_v5, %v1299_v17  ;;  %vm1368_vm15 = vcmask 57344  }
0x11c2   :  { %v807_v59 = vmul.f32 %v1570_v25, %v806_v10  ;;  %v1306_v16 = vadd.f32 %v1305_v11, %v1292_v36  ;;  %v1585_v36 = vld [vmem:[#allocation3 + $0x22] ss:$0 sm:$0xff]  ;;  %v969_v10 = vperm.slane %v1866_v49, 6 }
0x11c4   :  { %v808_v4 = vadd.f32 %v1570_v25, %v807_v59 }
0x11c6   :  { %v812_v63 = vsel %vm811_vm13, %v1570_v25, %v808_v4  ;;  %vm1078_vm13 = vcmask 1046534  }
0x11c7   :  { %v1984_v8 = vsel %vm814_vm14, %v816_v1, %v812_v63  ;;  %v902_v1 = vpop.permute.xlu1 %901 }
0x11c8   :  { %v840_v53 = vsub.f32 1.0, %v1984_v8  ;;  %v1311_v14 = vperm.slane %v1984_v8, %v1814_v26 }
0x11c9   :  { %v968_v56 = vpop.permute.xlu2 %967 }
0x11ca   :  { %v1308_v13 = vperm.slane %v840_v53, %v1814_v26  ;;  %v996_v15 = vmul.f32 %v968_v56, %v1953_v9  ;;  %v924_v63 = vmul.f32 %v902_v1, %v840_v53  ;;  %v1009_v1 = vrot.slane %v1869_v50, 1 }
0x11cc   :  { %v1313_v33 = vsel %vm1123_vm7, %v1308_v13, %v1311_v14  ;;  %v1004_v18 = vadd.f32 %v996_v15, %v923_v61 }
0x11cd   :  { %v1314_v28 = vadd.f32 %v1313_v33, %v1306_v16 }
0x11ce   :  { %1051 = vperm.xlu2 %1453, %v1004_v18  }
0x11cf   :  { %v1996_v19 = vsel %vm1316_vm1, %v1314_v28, %v1965_v0  ;;  %v995_v0 = vmul.f32 %v961_v55, %v1934_v34  ;;  %vm1373_vm1 = vcmask 0  }
0x11d0   :  { %v1320_v6 = vperm.slane %v1996_v19, 1 }
0x11d1   :  { %v1003_v40 = vadd.f32 %v995_v0, %v922_v52  ;;  %v909_v17 = vpop.permute.xlu2 %908  ;;  %v982_v0 = vpop.permute.xlu1 %981 }
0x11d2   :  { %v1321_v34 = vadd.f32 %v1320_v6, %v1859_v45 }
0x11d9   :  { %v933_v13 = vpop.permute.xlu2 %932 }
0x11da   :  { %v991_v53 = vmul.f32 %v933_v13, %v1809_v23 }
0x11dc   :  { %v627_v43 = vpop.permute.xlu0 %626 }
0x11dd   :  { %630 = vst.msk [vmem:[#allocation2 + $0x38] sm:$0xff] %vm110_vm0, %v627_v43 }
0x11e4   :  { %v940_v47 = vpop.permute.xlu0 %939  ;;  %v639_v46 = vld [vmem:[#allocation2 + $0x38] sm:$0xff] }
0x11e5   :  { %v992_v9 = vmul.f32 %v940_v47, %v1886_v31  ;;  %v648_v21 = vmul.f32 %v1585_v36, %v639_v46  ;;  %v1318_v31 = vperm.slane %v1996_v19, 0 }
0x11e7   :  { %v1000_v20 = vadd.f32 %v992_v9, %v919_v48  ;;  %v670_v25 = vsel %vm110_vm0, %v648_v21, 0.0  ;;  %v1319_v54 = vadd.f32 %v1318_v31, %v1852_v44 }
0x11e8   :  { %671 = vadd.xlane.f32.xlu0 %v670_v25  ;;  %v1345_v25 = vperm.slane %v1884_v22, 7  ;;  %v1083_v22 = vrot.slane %v1879_v2, 1 }
0x11e9   :  { %1039 = vperm.xlu1 %1451, %v1000_v20   ;;  %v1322_v35 = vmax.f32 %v1319_v54, %v1321_v34  ;;  %v1323_v51 = vmin.f32 %v1319_v54, %v1321_v34 }
0x11ea   :  { %vm1346_vm6 = vcmp.eq.s32.totalorder %v1345_v25, 1  ;;  %v1094_v34 = vsub.f32 %v1879_v2, %v1083_v22 }
0x11eb   :  { %v1324_v55 = vsub.f32 %v1323_v51, %v1322_v35  ;;  %v1108_v51 = vstv %s2027_s18 }
0x11ed   :  { %v1325_v59 = vmul.f32 1.442695, %v1324_v55  ;;  %v1095_v55 = vmul.f32 %v1094_v34, %v1866_v49 }
0x11ef   :  { %1573 = vpow2.f32 %v1325_v59  ;;  %v1096_v59 = vsel %vm1086_vm8, %v1095_v55, 0.0  ;;  %v1027_v55 = vmul.f32 %v1026_v29, %v1869_v50 }
0x11f1   :  { %1048 = vperm.xlu1 %1451, %v1003_v40  }
0x11fc   :  { %974 = vperm.xlu0 %1450, %v969_v10  }
0x1204   :  { %859 = vperm.xlu0 %1450, %v854_v32  }
0x120c   :  { %1452 = vset.pattern.permute.xlu0 %v1657_v3  ;;  %v1574_v3 = vpop.eup %1573 }
0x120d   :  { %1042 = vperm.xlu0 %1452, %v1978_v42   ;;  %v1327_v4 = vadd.f32 1.0, %v1574_v3  ;;  %v1330_v11 = vmul.f32 -0.5, %v1574_v3  ;;  %v1333_v33 = vand.u32 2147483647, %v1574_v3 }
0x120f   :  { %v1331_v16 = vadd.f32 1.0, %v1330_v11  ;;  %vm1334_vm5 = vcmp.lt.f32.partialorder %v1333_v33, 0.0004427343 }
0x1211   :  { %v1332_v48 = vmul.f32 %v1574_v3, %v1331_v16  ;;  %v1097_v3 = vrot.slane %v1096_v59, 4 }
0x125b   :  { %v672_v58 = vpop.xlane.xlu0 %671 }
0x125c   :  { %v681_v60 = vadd.f32 %v1800_v57, %v672_v58 }
0x125e   :  { %v1417_v62 = vmul.f32 -1.442695, %v681_v60  ;;  %v1040_v60 = vpop.permute.xlu1 %1039 }
0x125f   :  { %v1061_v13 = vperm.slane %v1040_v60, %v1814_v26 }
0x1260   :  { %1575 = vpow2.f32 %v1417_v62 }
0x1266   :  { %v1576_v42 = vpop.eup %1575 }
0x1267   :  { %v713_v27 = vadd.f32 1.0, %v1576_v42 }
0x1269   :  { %1577 = vrcp.f32 %v713_v27  ;;  %v830_v61 = vand.u32 2147483648, %v713_v27  ;;  %v828_v15 = vand.u32 2147483647, %v713_v27  ;;  %vm824_vm2 = vweird.f32 %v713_v27 }
0x126a   :  { %1579 = vlog2.f32 %v1327_v4  ;;  %v1098_v4 = vadd.f32 %v1097_v3, %v1096_v59 }
0x126b   :  { %v831_v47 = vor.u32 1.1754944e-38, %v830_v61  ;;  %vm829_vm4 = vcmp.eq.f32.partialorder %v828_v15, 8.507059e+37 }
0x126c   :  { %v1099_v11 = vrot.slane %v1098_v4, 2 }
0x126e   :  { %v975_v44 = vpop.permute.xlu0 %974 }
0x126f   :  { %v1578_v45 = vpop.eup %1577  ;;  %v997_v5 = vmul.f32 %v975_v44, %v1984_v8  ;;  %v1013_v44 = vmul.f32 %v1012_v38, %v1869_v50 }
0x1270   :  { %v820_v7 = vmul.f32 %v1578_v45, %v713_v27  ;;  %v1580_v56 = vpop.eup %1579  ;;  %vm825_vm0 = vweird.f32 %v1578_v45 }
0x1271   :  { %v1005_v12 = vadd.f32 %v997_v5, %v924_v63  ;;  %v1329_v43 = vmul.f32 0.6931472, %v1580_v56  ;;  %vm826_vm3 = vmor %vm824_vm2, %vm825_vm0 }
0x1272   :  { %v821_v57 = vsub.f32 1.0, %v820_v7  ;;  %v1049_v7 = vpop.permute.xlu1 %1048 }
0x1273   :  { %1054 = vperm.xlu1 %1451, %v1005_v12   ;;  %v1335_v20 = vsel %vm1334_vm5, %v1332_v48, %v1329_v43  ;;  %v1046_v12 = vpop.permute.xlu2 %1045 }
0x1274   :  { %v822_v14 = vmul.f32 %v1578_v45, %v821_v57 }
0x1276   :  { %v860_v18 = vpop.permute.xlu0 %859  ;;  %v823_v28 = vadd.f32 %v1578_v45, %v822_v14  ;;  %v1100_v14 = vadd.f32 %v1099_v11, %v1098_v4 }
0x1277   :  { %v918_v8 = vmul.f32 %v860_v18, %v834_v24  ;;  %v1336_v24 = vadd.f32 %v1335_v20, %v1322_v35  ;;  %v1106_v35 = vstv %s2025_s17  ;;  %v1023_v18 = vmul.f32 %v1022_v41, %v1866_v49 }
0x1278   :  { %v827_v46 = vsel %vm826_vm3, %v1578_v45, %v823_v28  ;;  %v1014_v45 = vrot.slane %v1866_v49, 1  ;;  %v1063_v28 = vperm.slane %v1046_v12, %v1814_v26  ;;  %v1103_v20 = vmul.f32 %v1879_v2, %v1866_v49 }
0x1279   :  { %v999_v9 = vadd.f32 %v991_v53, %v918_v8  ;;  %v832_v36 = vsel %vm829_vm4, %v831_v47, %v827_v46  ;;  %v1101_v8 = vrot.slane %v1100_v14, 1  ;;  %v1064_v47 = vperm.slane %v1049_v7, %v1814_v26 }
0x127a   :  { %v841_v21 = vsub.f32 1.0, %v832_v36  ;;  %v998_v40 = vmul.f32 %v982_v0, %v832_v36  ;;  %v1341_v23 = vperm.slane %v832_v36, %v1814_v26  ;;  %v1016_v61 = vmul.f32 %v1014_v45, %v1013_v44 }
0x127b   :  { %1113 = vperm.xlu2 %1453, %v999_v9   ;;  %v1024_v48 = vmul.f32 %v1023_v18, %v1014_v45  ;;  %v1102_v41 = vadd.f32 %v1101_v8, %v1100_v14 }
0x127c   :  { %v925_v52 = vmul.f32 %v909_v17, %v841_v21  ;;  %v1338_v10 = vperm.slane %v841_v21, %v1814_v26  ;;  %v1008_v17 = vmul.f32 %v1007_v37, %v1869_v50  ;;  %v1019_v37 = vmul.f32 %v1018_v39, %v1866_v49  ;;  %v1052_v39 = vpop.permute.xlu2 %1051 }
0x127d   :  { %v1065_v21 = vperm.slane %v1052_v39, %v1814_v26 }
0x127e   :  { %v1006_v32 = vadd.f32 %v998_v40, %v925_v52  ;;  %v1343_v31 = vsel %vm1123_vm7, %v1338_v10, %v1341_v23  ;;  %v1011_v56 = vmul.f32 %v1009_v1, %v1008_v17  ;;  %v1020_v33 = vmul.f32 %v1019_v37, %v1009_v1 }
0x127f   :  { %v1344_v6 = vadd.f32 %v1343_v31, %v1336_v24  ;;  %v1043_v63 = vpop.permute.xlu0 %1042 }
0x1280   :  { %1057 = vperm.xlu0 %1452, %v1006_v32   ;;  %v1062_v57 = vperm.slane %v1043_v63, %v1814_v26  ;;  %v1017_v16 = vadd.f32 %v1016_v61, %v1011_v56  ;;  %v1104_v32 = vadd.f32 %v1103_v20, %v1102_v41 }
0x1281   :  { %v1347_v54 = vsel %vm1346_vm6, %v1344_v6, %v1996_v19  ;;  %v1127_v19 = vsel %vm1123_vm7, %v1106_v35, %v1108_v51  ;;  %vm1068_vm7 = vcmask 1041409  }
0x1282   :  { %v1348_v58 = vadd.f32 %v1347_v54, %v1127_v19  ;;  %v1069_v15 = vsel %vm1068_vm7, %v1062_v57, %v1061_v13  ;;  %v1021_v46 = vadd.f32 %v1020_v33, %v1017_v16  ;;  %v1105_v49 = vsub.f32 1.0, %v1104_v32 }
0x1283   :  { %v1071_v43 = vsel %vm1070_vm9, %v1063_v28, %v1069_v15  ;;  %v1109_v2 = vmul.f32 %v1108_v51, %v1104_v32 }
0x1284   :  { %v1350_v62 = vrot.slane %v1348_v58, 1  ;;  %v1073_v36 = vsel %vm1072_vm10, %v1064_v47, %v1071_v43  ;;  %v1025_v0 = vadd.f32 %v1024_v48, %v1021_v46  ;;  %v1107_v3 = vmul.f32 %v1106_v35, %v1105_v49 }
0x1285   :  { %v1075_v40 = vsel %vm1074_vm11, %v1065_v21, %v1073_v36 }
0x1286   :  { %v2042_v42 = vmax.f32 %v1348_v58, %v1350_v62  ;;  %v1353_v27 = vmin.f32 %v1348_v58, %v1350_v62  ;;  %v1586_v58 = vld [vmem:[%s2090_s2] sm:$0xff]  ;;  %v1110_v50 = vadd.f32 %v1109_v2, %v1107_v3  ;;  %s1667_s2 = smov [#allocation8]  }
0x1287   :  { %v1029_v59 = vmul.f32 %v1586_v58, %v1028_v30  ;;  %s1380_s21 = sshll.u32 %s1667_s2, 4  ;;  %s1381_s21 = int_to_ptr.vmem [resolvable:$true] %s1380_s21 }
0x1288   :  { %v1354_v5 = vsub.f32 %v1353_v27, %v2042_v42  ;;  %v1120_v12 = vrot.slane %v1110_v50, 7 }
0x1289   :  { %v1030_v17 = vadd.f32 %v1029_v59, %v1027_v55 }
0x128a   :  { %v1355_v38 = vmul.f32 1.442695, %v1354_v5 }
0x128c   :  { %1581 = vpow2.f32 %v1355_v38 }
0x1292   :  { %v1582_v25 = vpop.eup %1581 }
0x1293   :  { %v1357_v31 = vadd.f32 1.0, %v1582_v25  ;;  %v1360_v60 = vmul.f32 -0.5, %v1582_v25  ;;  %v1363_v45 = vand.u32 2147483647, %v1582_v25 }
0x1295   :  { %1583 = vlog2.f32 %v1357_v31  ;;  %v1361_v1 = vadd.f32 1.0, %v1360_v60  ;;  %vm1364_vm14 = vcmp.lt.f32.partialorder %v1363_v45, 0.0004427343 }
0x1297   :  { %v1362_v7 = vmul.f32 %v1582_v25, %v1361_v1 }
0x129b   :  { %v1584_v27 = vpop.eup %1583 }
0x129c   :  { %v1359_v63 = vmul.f32 0.6931472, %v1584_v27 }
0x129e   :  { %v1365_v35 = vsel %vm1364_vm14, %v1362_v7, %v1359_v63 }
0x129f   :  { %v1366_v56 = vadd.f32 %v1365_v35, %v2042_v42 }
0x12e5   :  { %v1055_v53 = vpop.permute.xlu1 %1054 }
0x12e6   :  { %v1066_v9 = vperm.slane %v1055_v53, %v1814_v26 }
0x12e8   :  { %v1077_v23 = vsel %vm1076_vm12, %v1066_v9, %v1075_v40 }
0x12f2   :  { %v1058_v52 = vpop.permute.xlu0 %1057 }
0x12f3   :  { %v1067_v10 = vperm.slane %v1058_v52, %v1814_v26 }
0x12f5   :  { %v1079_v24 = vsel %vm1078_vm13, %v1067_v10, %v1077_v23 }
0x12f6   :  { %v1081_v6 = vadd.f32 %v1079_v24, %v1025_v0 }
0x12f8   :  { %v1085_v54 = vmul.f32 %v1083_v22, %v1081_v6  ;;  %v1114_v22 = vpop.permute.xlu2 %1113 }
0x12f9   :  { %v1115_v44 = vperm.slane %v1114_v22, %v1814_v26 }
0x12fa   :  { %v1087_v34 = vsel %vm1086_vm8, %v1085_v54, 0.0 }
0x12fb   :  { %v1088_v19 = vrot.slane %v1087_v34, 4  ;;  %v1117_v30 = vadd.f32 %v1115_v44, %v1030_v17 }
0x12fd   :  { %v1089_v62 = vadd.f32 %v1088_v19, %v1087_v34 }
0x12ff   :  { %v1090_v4 = vrot.slane %v1089_v62, 2 }
0x1301   :  { %v1091_v29 = vadd.f32 %v1090_v4, %v1089_v62 }
0x1303   :  { %v1092_v5 = vrot.slane %v1091_v29, 1 }
0x1305   :  { %v1093_v11 = vadd.f32 %v1092_v5, %v1091_v29 }
0x1307   :  { %v1118_v57 = vadd.f32 %v1117_v30, %v1093_v11 }
0x1309   :  { %v1122_v51 = vadd.f32 %v1120_v12, %v1118_v57 }
0x130b   :  { %v1367_v61 = vsub.f32 %v1122_v51, %v1366_v56 }
0x130d   :  { %v1369_v37 = vsel %vm1368_vm15, %v1367_v61, 0.0 }
0x130e   :  { %1370 = vadd.xlane.f32.xlu1 %v1369_v37 }
0x1381   :  { %v1371_v26 = vpop.xlane.xlu1 %1370 }
0x1382   :  { %v1372_v13 = vsub.f32 0.0, %v1371_v26 }
0x1384   :  { %1374 = vst.msk [vmem:[#allocation8] sm:$0x1] %vm1373_vm1, %v1372_v13 }
0x1385   :  { %1385 = dma.vmem_to_hbm [thread:$0]  %s1381_s21, 16, %s1383_s24, [#allocation5]  }
0x1386   :  { %1651 = dma.done.wait [#allocation5], 16  }
0x1387   :  { %1652 = vsyncadd [#allocation5], 4294967280 }
0x1388   :  { %1390 = vsyncpa [#allocation4], 1 }
0x1389   :  { %1391 = vsyncpa [#allocation5], 1 }
0x138a   :  { %1392 = vsyncpa [#allocation6], 1 }

</bundles_post_ra>
